<compile_context>
chip_gen: v5e
topology: v5e:2x2
jax: 0.10.0
libtpu: 0.0.40
codegen_flags: <defaults>
</compile_context>

<pallas_src>
import math
import functools

import jax
import jax.numpy as jnp
from jax.experimental import pallas as pl
from jax.experimental.pallas import tpu as pltpu

# ---------------- tiny model config (stand-in for Llama-3.2-3B) -------------
VOCAB = 128
HIDDEN = 64
INTER = 128
N_LAYERS = 2
N_HEADS = 4
N_KV_HEADS = 2
HEAD_DIM = HIDDEN // N_HEADS             # 16
HALF = HEAD_DIM // 2                     # 8
REP = N_HEADS // N_KV_HEADS              # GQA repeat factor (2)
Q_D = N_HEADS * HEAD_DIM                 # 64
KV_D = N_KV_HEADS * HEAD_DIM             # 32
QKV_D = Q_D + 2 * KV_D                   # 128  -> lane-dense fused QKV output
GU_D = 2 * INTER                         # 256  -> lane-dense fused gate/up out
EMB_DIM = 48                             # combined_embedding feature dim
RMS_EPS = 1e-5
ROPE_THETA = 10000.0
NEG_INF = -1e9


# ============================ in-kernel helpers =============================
def _rmsnorm(x, w):
    var = jnp.mean(x * x, axis=-1, keepdims=True)
    return x * jax.lax.rsqrt(var + RMS_EPS) * w


# ========================= fused transformer layer ==========================
def layer_kernel(x0_ref, keyb_ref, cs_ref,
                 attn_norm_ref, wqkv_ref, wo_ref,
                 mlp_norm_ref, wgu_ref, wd_ref,
                 out_ref, attn_sc, *, seq):
    l = pl.program_id(1)

    # Residual stream lives directly in the VMEM-resident output block
    # (same block index for every layer); written back to HBM only once
    # per batch, after the last layer.
    @pl.when(l == 0)
    def _():
        out_ref[...] = x0_ref[...]

    x = out_ref[0]                                        # (S, D) f32
    scale = 1.0 / math.sqrt(HEAD_DIM)

    # packed [cos | sin], pre-tiled to all 128 QKV lanes (V lanes: cos=1, sin=0)
    cs = cs_ref[...]                                      # (S, 2*QKV_D) f32
    cos = cs[:, :QKV_D]
    sin = cs[:, QKV_D:]

    # causal + key-pad bias directly in the stacked (REP*S, S) score layout
    rowi = jax.lax.broadcasted_iota(jnp.int32, (REP * seq, seq), 0)
    coli = jax.lax.broadcasted_iota(jnp.int32, (REP * seq, seq), 1)
    qpos = jax.lax.rem(rowi, seq)
    bias = jnp.where(coli <= qpos, 0.0, NEG_INF) + keyb_ref[0]   # (REP*S, S)

    # ---------------- attention block ----------------
    h = _rmsnorm(x, attn_norm_ref[0])                     # (S, D)
    qkv = jnp.dot(h.astype(jnp.bfloat16), wqkv_ref[0],
                  preferred_element_type=jnp.float32)     # (S, 128) f32

    # full-width RoPE: one vreg-wide roll pair + sign/select, all heads at once
    lane = jax.lax.broadcasted_iota(jnp.int32, (seq, QKV_D), 1)
    second = jax.lax.rem(lane, HEAD_DIM) >= HALF
    rot = jnp.where(second,
                    pltpu.roll(qkv, HALF, axis=1),
                    -pltpu.roll(qkv, QKV_D - HALF, axis=1))
    roped = qkv * cos + rot * sin                         # (S, 128) f32

    # hoisted bf16 casts of K / V (used by both kv groups)
    k_all = roped[:, Q_D:Q_D + KV_D].astype(jnp.bfloat16)        # (S, KV_D)
    v_all = qkv[:, Q_D + KV_D:QKV_D].astype(jnp.bfloat16)        # (S, KV_D)

    for j in range(N_KV_HEADS):                           # static unroll (2)
        # stack the REP query heads of this kv group along rows, cast once
        base = j * REP * HEAD_DIM
        q_stack = jnp.concatenate(
            [roped[:, base + r * HEAD_DIM: base + (r + 1) * HEAD_DIM]
             for r in range(REP)], axis=0).astype(jnp.bfloat16)  # (REP*S, Dh)
        k_j = k_all[:, j * HEAD_DIM:(j + 1) * HEAD_DIM]          # (S, Dh)
        v_j = v_all[:, j * HEAD_DIM:(j + 1) * HEAD_DIM]          # (S, Dh)

        s = jax.lax.dot_general(q_stack, k_j, (((1,), (1,)), ((), ())),
                                preferred_element_type=jnp.float32)
        s = s * scale + bias                                      # (REP*S, S)
        m = jnp.max(s, axis=-1, keepdims=True)
        p = jnp.exp(s - m)
        p = p * pl.reciprocal(jnp.sum(p, axis=-1, keepdims=True),
                              approx=True)
        o = jnp.dot(p.astype(jnp.bfloat16), v_j,
                    preferred_element_type=jnp.float32)           # (REP*S, Dh)

        # direct stores into the O-proj operand scratch at fixed lane offsets
        for r in range(REP):
            hcol = (j * REP + r) * HEAD_DIM
            attn_sc[:, hcol:hcol + HEAD_DIM] = o[r * seq:(r + 1) * seq, :]

    x = x + jnp.dot(attn_sc[...].astype(jnp.bfloat16), wo_ref[0],
                    preferred_element_type=jnp.float32)

    # ---------------- SwiGLU MLP (fused gate/up) ----------------
    h2 = _rmsnorm(x, mlp_norm_ref[0])
    gu = jnp.dot(h2.astype(jnp.bfloat16), wgu_ref[0],
                 preferred_element_type=jnp.float32)              # (S, 2*INTER)
    g = gu[:, :INTER]
    u = gu[:, INTER:]
    act = g * jax.nn.sigmoid(g) * u                               # f32 (v5e-safe)
    x = x + jnp.dot(act.astype(jnp.bfloat16), wd_ref[0],
                    preferred_element_type=jnp.float32)

    out_ref[0] = x


# ============== fused final-norm + LM head + CE + aux MSE kernel ============
def head_kernel(x_ref, final_norm_ref, lm_head_ref, target_ref,
                emb_ref, proj_w_ref, proj_b_ref,
                last_hidden_ref, logits_ref, lm_loss_ref, aux_loss_ref,
                *, batch, seq):
    x = x_ref[...]                                            # (N, D) f32
    lh = _rmsnorm(x, final_norm_ref[...])                     # (N, D)
    last_hidden_ref[...] = lh

    logits = jnp.dot(lh.astype(jnp.bfloat16), lm_head_ref[...],
                     preferred_element_type=jnp.float32)      # (N, V)
    logits_ref[...] = logits

    # shifted causal-LM cross-entropy, ignore_index = -100
    tgt = target_ref[...]                                     # (N, 1) int32
    m = jnp.max(logits, axis=-1, keepdims=True)
    lse = jnp.log(jnp.sum(jnp.exp(logits - m), axis=-1, keepdims=True)) + m
    colv = jax.lax.broadcasted_iota(jnp.int32, logits.shape, 1)
    tgt_logit = jnp.sum(jnp.where(colv == tgt, logits, 0.0),
                        axis=-1, keepdims=True)
    valid = (tgt != -100).astype(jnp.float32)
    lm_loss = jnp.sum((lse - tgt_logit) * valid) / jnp.maximum(
        jnp.sum(valid), 1.0)
    lm_loss_ref[...] = lm_loss.reshape(1, 1)

    # aux: embedding_projection(combined_embedding) vs mean-pooled last hidden
    # (unmasked mean over all positions, matching hidden_states[-1].mean(dim=1))
    proj = jnp.dot(emb_ref[...].astype(jnp.bfloat16), proj_w_ref[...],
                   preferred_element_type=jnp.float32) + proj_b_ref[...]
    summ = jnp.concatenate(
        [jnp.mean(lh[b * seq:(b + 1) * seq, :], axis=0, keepdims=True)
         for b in range(batch)], axis=0)                      # (B, D)
    diff = proj - summ
    aux_loss_ref[...] = jnp.mean(diff * diff).reshape(1, 1)


# =============================== parameters =================================
def init_params(key):
    s = 0.02

    def nxt():
        nonlocal key
        key, sub = jax.random.split(key)
        return sub

    def w(shape):
        return jax.random.normal(nxt(), shape, jnp.float32) * s

    return {
        "embed": w((VOCAB, HIDDEN)),
        "attn_norm": jnp.ones((N_LAYERS, 1, HIDDEN), jnp.float32),
        "mlp_norm": jnp.ones((N_LAYERS, 1, HIDDEN), jnp.float32),
        "wqkv": w((N_LAYERS, HIDDEN, QKV_D)).astype(jnp.bfloat16),
        "wo": w((N_LAYERS, HIDDEN, HIDDEN)).astype(jnp.bfloat16),
        "wgu": w((N_LAYERS, HIDDEN, GU_D)).astype(jnp.bfloat16),
        "wd": w((N_LAYERS, INTER, HIDDEN)).astype(jnp.bfloat16),
        "final_norm": jnp.ones((1, HIDDEN), jnp.float32),
        "lm_head": w((HIDDEN, VOCAB)).astype(jnp.bfloat16),
        "proj_w": w((EMB_DIM, HIDDEN)).astype(jnp.bfloat16),
        "proj_b": jnp.zeros((1, HIDDEN), jnp.float32),
    }


# ============================ model glue (JAX) ==============================
def full_model_forward(params, input_ids, attention_mask, labels,
                       combined_embedding):
    B, S = input_ids.shape
    N = B * S

    x0 = params["embed"][input_ids]                                # (B, S, D)
    keybias = jnp.where(attention_mask > 0, 0.0, NEG_INF).astype(
        jnp.float32).reshape(B, 1, S)

    # RoPE tables packed into ONE lane-dense resident input:
    # [cos | sin], each tiled to all 128 fused-QKV lanes (V lanes: cos=1,sin=0).
    pos = jnp.arange(S, dtype=jnp.float32)
    freqs = 1.0 / (ROPE_THETA ** (jnp.arange(HALF, dtype=jnp.float32) / HALF))
    ang = pos[:, None] * freqs[None, :]                            # (S, HALF)
    n_qk_heads = (Q_D + KV_D) // HEAD_DIM
    cos_qk = jnp.tile(jnp.tile(jnp.cos(ang), (1, 2)), (1, n_qk_heads))
    sin_qk = jnp.tile(jnp.tile(jnp.sin(ang), (1, 2)), (1, n_qk_heads))
    cos_full = jnp.concatenate(
        [cos_qk, jnp.ones((S, QKV_D - Q_D - KV_D), jnp.float32)], axis=1)
    sin_full = jnp.concatenate(
        [sin_qk, jnp.zeros((S, QKV_D - Q_D - KV_D), jnp.float32)], axis=1)
    rope_cs = jnp.concatenate([cos_full, sin_full], axis=1)        # (S, 256)

    # --- one fused pallas_call for all transformer layers ---
    x_final = pl.pallas_call(
        functools.partial(layer_kernel, seq=S),
        grid=(B, N_LAYERS),
        in_specs=[
            pl.BlockSpec((1, S, HIDDEN), lambda b, l: (b, 0, 0)),       # x0
            pl.BlockSpec((1, 1, S), lambda b, l: (b, 0, 0)),            # key bias
            pl.BlockSpec((S, 2 * QKV_D), lambda b, l: (0, 0)),          # cos|sin
            pl.BlockSpec((1, 1, HIDDEN), lambda b, l: (l, 0, 0)),       # attn_norm
            pl.BlockSpec((1, HIDDEN, QKV_D), lambda b, l: (l, 0, 0)),   # wqkv
            pl.BlockSpec((1, HIDDEN, HIDDEN), lambda b, l: (l, 0, 0)),  # wo
            pl.BlockSpec((1, 1, HIDDEN), lambda b, l: (l, 0, 0)),       # mlp_norm
            pl.BlockSpec((1, HIDDEN, GU_D), lambda b, l: (l, 0, 0)),    # wgu
            pl.BlockSpec((1, INTER, HIDDEN), lambda b, l: (l, 0, 0)),   # wd
        ],
        out_specs=pl.BlockSpec((1, S, HIDDEN), lambda b, l: (b, 0, 0)),
        out_shape=jax.ShapeDtypeStruct((B, S, HIDDEN), jnp.float32),
        scratch_shapes=[pltpu.VMEM((S, Q_D), jnp.float32)],             # attn out
        compiler_params=pltpu.CompilerParams(
            dimension_semantics=("parallel", "arbitrary")),
    )(x0, keybias, rope_cs,
      params["attn_norm"], params["wqkv"], params["wo"],
      params["mlp_norm"], params["wgu"], params["wd"])

    # shifted targets: logits at position s predict labels[s+1]; pad with -100
    tgt = jnp.concatenate(
        [labels[:, 1:], jnp.full((B, 1), -100, labels.dtype)], axis=1)
    tgt = tgt.reshape(N, 1).astype(jnp.int32)
    emb = combined_embedding.reshape(B, EMB_DIM).astype(jnp.float32)
    x_flat = x_final.reshape(N, HIDDEN)

    # --- one fused head kernel: final norm + LM head + CE + aux MSE ---
    last_hidden, logits, lm_loss, aux_loss = pl.pallas_call(
        functools.partial(head_kernel, batch=B, seq=S),
        out_shape=(
            jax.ShapeDtypeStruct((N, HIDDEN), jnp.float32),
            jax.ShapeDtypeStruct((N, VOCAB), jnp.float32),
            jax.ShapeDtypeStruct((1, 1), jnp.float32),
            jax.ShapeDtypeStruct((1, 1), jnp.float32),
        ),
    )(x_flat, params["final_norm"], params["lm_head"], tgt, emb,
      params["proj_w"], params["proj_b"])

    lm_loss = lm_loss[0, 0]
    aux_loss = aux_loss[0, 0]
    return {
        "loss": lm_loss + aux_loss,
        "lm_loss": lm_loss,
        "aux_loss": aux_loss,
        "logits": logits.reshape(B, S, VOCAB),
        "last_hidden_state": last_hidden.reshape(B, S, HIDDEN),
    }


# ================================= main =====================================
if __name__ == "__main__":
    key = jax.random.PRNGKey(0)
    kp, kids, kemb = jax.random.split(key, 3)
    params = init_params(kp)

    B, S = 2, 8
    input_ids = jax.random.randint(kids, (B, S), 0, VOCAB, dtype=jnp.int32)
    attention_mask = jnp.array([[1, 1, 1, 1, 1, 1, 1, 1],
                                [1, 1, 1, 1, 1, 1, 0, 0]], dtype=jnp.int32)
    labels = jnp.where(attention_mask == 1, input_ids, -100)
    combined_embedding = jax.random.normal(kemb, (B, 1, EMB_DIM), jnp.float32)

    fwd = jax.jit(full_model_forward)
    out = fwd(params, input_ids, attention_mask, labels, combined_embedding)
    jax.block_until_ready(out)
    assert jnp.isfinite(out["loss"]), "non-finite loss"
    print("KERNEL_OK")
</pallas_src>

<mosaic_0001>
module attributes {stable_mosaic.version = 11 : i64} {
  func.func @head_kernel(%arg0: memref<16x64xf32, #tpu.memory_space<vmem>>, %arg1: memref<1x64xf32, #tpu.memory_space<vmem>>, %arg2: memref<64x128xbf16, #tpu.memory_space<vmem>>, %arg3: memref<16x1xi32, #tpu.memory_space<vmem>>, %arg4: memref<2x48xf32, #tpu.memory_space<vmem>>, %arg5: memref<48x64xbf16, #tpu.memory_space<vmem>>, %arg6: memref<1x64xf32, #tpu.memory_space<vmem>>, %arg7: memref<16x64xf32, #tpu.memory_space<vmem>>, %arg8: memref<16x128xf32, #tpu.memory_space<vmem>>, %arg9: memref<1x1xf32, #tpu.memory_space<vmem>>, %arg10: memref<1x1xf32, #tpu.memory_space<vmem>>) attributes {dimension_semantics = [], scalar_prefetch = 0 : i64, scratch_operands = 0 : i64, tpu.core_type = #tpu.core_type<tc>} {
    %c0 = arith.constant 0 : index
    %c0_0 = arith.constant 0 : index
    %0 = vector.load %arg0[%c0, %c0_0] : memref<16x64xf32, #tpu.memory_space<vmem>>, vector<16x64xf32>
    %c0_1 = arith.constant 0 : index
    %c0_2 = arith.constant 0 : index
    %1 = vector.load %arg1[%c0_1, %c0_2] : memref<1x64xf32, #tpu.memory_space<vmem>>, vector<1x64xf32>
    %2 = arith.mulf %0, %0 : vector<16x64xf32>
    %cst = arith.constant dense<0.000000e+00> : vector<16xf32>
    %3 = vector.multi_reduction <add>, %2, %cst [1] : vector<16x64xf32> to vector<16xf32>
    %4 = vector.shape_cast %3 : vector<16xf32> to vector<16x1xf32>
    %cst_3 = arith.constant 6.400000e+01 : f32
    %5 = vector.broadcast %cst_3 : f32 to vector<16x1xf32>
    %6 = arith.divf %4, %5 : vector<16x1xf32>
    %cst_4 = arith.constant 9.99999974E-6 : f32
    %7 = vector.broadcast %cst_4 : f32 to vector<16x1xf32>
    %8 = arith.addf %6, %7 : vector<16x1xf32>
    %9 = math.rsqrt %8 : vector<16x1xf32>
    %10 = vector.broadcast %9 : vector<16x1xf32> to vector<16x64xf32>
    %11 = arith.mulf %0, %10 : vector<16x64xf32>
    %12 = vector.broadcast %1 : vector<1x64xf32> to vector<16x64xf32>
    %13 = arith.mulf %11, %12 : vector<16x64xf32>
    %c0_5 = arith.constant 0 : index
    %c0_6 = arith.constant 0 : index
    %14 = vector.load %arg7[%c0_5, %c0_6] : memref<16x64xf32, #tpu.memory_space<vmem>>, vector<16x64xf32>
    tpu.vector_store %arg7[%c0_5, %c0_6], %13 {strides = array<i32>} : memref<16x64xf32, #tpu.memory_space<vmem>>, vector<16x64xf32>,
    %15 = arith.truncf %13 : vector<16x64xf32> to vector<16x64xbf16>
    %c0_7 = arith.constant 0 : index
    %c0_8 = arith.constant 0 : index
    %16 = vector.load %arg2[%c0_7, %c0_8] : memref<64x128xbf16, #tpu.memory_space<vmem>>, vector<64x128xbf16>
    %cst_9 = arith.constant dense<0.000000e+00> : vector<16x128xf32>
    %17 = tpu.matmul %15, %16, %cst_9 {dimension_numbers = #tpu.dot_dimension_numbers<[1], [0], [0], [1], [0, 0, 1, 1], [], []>} : vector<16x64xbf16>, vector<64x128xbf16>, vector<16x128xf32> -> vector<16x128xf32>
    %c0_10 = arith.constant 0 : index
    %c0_11 = arith.constant 0 : index
    %18 = vector.load %arg8[%c0_10, %c0_11] : memref<16x128xf32, #tpu.memory_space<vmem>>, vector<16x128xf32>
    tpu.vector_store %arg8[%c0_10, %c0_11], %17 {strides = array<i32>} : memref<16x128xf32, #tpu.memory_space<vmem>>, vector<16x128xf32>,
    %c0_12 = arith.constant 0 : index
    %c0_13 = arith.constant 0 : index
    %19 = vector.load %arg3[%c0_12, %c0_13] : memref<16x1xi32, #tpu.memory_space<vmem>>, vector<16x1xi32>
    %cst_14 = arith.constant dense<0xFF800000> : vector<16xf32>
    %20 = vector.multi_reduction <maximumf>, %17, %cst_14 [1] : vector<16x128xf32> to vector<16xf32>
    %21 = vector.shape_cast %20 : vector<16xf32> to vector<16x1xf32>
    %22 = vector.broadcast %21 : vector<16x1xf32> to vector<16x128xf32>
    %23 = arith.subf %17, %22 : vector<16x128xf32>
    %24 = math.exp %23 : vector<16x128xf32>
    %cst_15 = arith.constant dense<0.000000e+00> : vector<16xf32>
    %25 = vector.multi_reduction <add>, %24, %cst_15 [1] : vector<16x128xf32> to vector<16xf32>
    %26 = vector.shape_cast %25 : vector<16xf32> to vector<16x1xf32>
    %27 = math.log %26 : vector<16x1xf32>
    %28 = arith.addf %27, %21 : vector<16x1xf32>
    %29 = tpu.iota {dimensions = array<i32: 1>} : vector<16x128xi32>
    %30 = vector.broadcast %19 : vector<16x1xi32> to vector<16x128xi32>
    %31 = arith.cmpi eq, %29, %30 : vector<16x128xi32>
    %cst_16 = arith.constant 0.000000e+00 : f32
    %32 = vector.broadcast %cst_16 : f32 to vector<16x128xf32>
    %33 = arith.select %31, %17, %32 : vector<16x128xi1>, vector<16x128xf32>
    %cst_17 = arith.constant dense<0.000000e+00> : vector<16xf32>
    %34 = vector.multi_reduction <add>, %33, %cst_17 [1] : vector<16x128xf32> to vector<16xf32>
    %35 = vector.shape_cast %34 : vector<16xf32> to vector<16x1xf32>
    %c-100_i32 = arith.constant -100 : i32
    %36 = vector.broadcast %c-100_i32 : i32 to vector<16x1xi32>
    %37 = arith.cmpi ne, %19, %36 : vector<16x1xi32>
    %38 = arith.extui %37 : vector<16x1xi1> to vector<16x1xi32>
    %39 = arith.sitofp %38 : vector<16x1xi32> to vector<16x1xf32>
    %40 = arith.subf %28, %35 : vector<16x1xf32>
    %41 = arith.mulf %40, %39 : vector<16x1xf32>
    %42 = vector.shape_cast %41 : vector<16x1xf32> to vector<1x16x1xf32>
    %cst_18 = arith.constant dense<0.000000e+00> : vector<1xf32>
    %43 = vector.multi_reduction <add>, %42, %cst_18 [1, 2] : vector<1x16x1xf32> to vector<1xf32>
    %44 = vector.shape_cast %43 : vector<1xf32> to vector<1x1x1xf32>
    %45 = vector.extract %44[0, 0, 0] : f32 from vector<1x1x1xf32>
    %46 = vector.shape_cast %39 : vector<16x1xf32> to vector<1x16x1xf32>
    %cst_19 = arith.constant dense<0.000000e+00> : vector<1xf32>
    %47 = vector.multi_reduction <add>, %46, %cst_19 [1, 2] : vector<1x16x1xf32> to vector<1xf32>
    %48 = vector.shape_cast %47 : vector<1xf32> to vector<1x1x1xf32>
    %49 = vector.extract %48[0, 0, 0] : f32 from vector<1x1x1xf32>
    %cst_20 = arith.constant 1.000000e+00 : f32
    %50 = arith.maximumf %49, %cst_20 : f32
    %51 = arith.divf %45, %50 : f32
    %52 = vector.broadcast %51 : f32 to vector<1x1xf32>
    %c0_21 = arith.constant 0 : index
    %c0_22 = arith.constant 0 : index
    %53 = vector.load %arg9[%c0_21, %c0_22] : memref<1x1xf32, #tpu.memory_space<vmem>>, vector<1x1xf32>
    tpu.vector_store %arg9[%c0_21, %c0_22], %52 {strides = array<i32>} : memref<1x1xf32, #tpu.memory_space<vmem>>, vector<1x1xf32>,
    %c0_23 = arith.constant 0 : index
    %c0_24 = arith.constant 0 : index
    %54 = vector.load %arg4[%c0_23, %c0_24] : memref<2x48xf32, #tpu.memory_space<vmem>>, vector<2x48xf32>
    %55 = arith.truncf %54 : vector<2x48xf32> to vector<2x48xbf16>
    %c0_25 = arith.constant 0 : index
    %c0_26 = arith.constant 0 : index
    %56 = vector.load %arg5[%c0_25, %c0_26] : memref<48x64xbf16, #tpu.memory_space<vmem>>, vector<48x64xbf16>
    %cst_27 = arith.constant dense<0.000000e+00> : vector<2x64xf32>
    %57 = tpu.matmul %55, %56, %cst_27 {dimension_numbers = #tpu.dot_dimension_numbers<[1], [0], [0], [1], [0, 0, 1, 1], [], []>} : vector<2x48xbf16>, vector<48x64xbf16>, vector<2x64xf32> -> vector<2x64xf32>
    %c0_28 = arith.constant 0 : index
    %c0_29 = arith.constant 0 : index
    %58 = vector.load %arg6[%c0_28, %c0_29] : memref<1x64xf32, #tpu.memory_space<vmem>>, vector<1x64xf32>
    %59 = vector.broadcast %58 : vector<1x64xf32> to vector<2x64xf32>
    %60 = arith.addf %57, %59 : vector<2x64xf32>
    %61 = vector.extract_strided_slice %13 {offsets = [0, 0], sizes = [8, 64], strides = [1, 1]} : vector<16x64xf32> to vector<8x64xf32>
    %cst_30 = arith.constant dense<0.000000e+00> : vector<64xf32>
    %62 = vector.multi_reduction <add>, %61, %cst_30 [0] : vector<8x64xf32> to vector<64xf32>
    %63 = vector.shape_cast %62 : vector<64xf32> to vector<1x64xf32>
    %cst_31 = arith.constant 8.000000e+00 : f32
    %64 = vector.broadcast %cst_31 : f32 to vector<1x64xf32>
    %65 = arith.divf %63, %64 : vector<1x64xf32>
    %66 = vector.extract_strided_slice %13 {offsets = [8, 0], sizes = [8, 64], strides = [1, 1]} : vector<16x64xf32> to vector<8x64xf32>
    %cst_32 = arith.constant dense<0.000000e+00> : vector<64xf32>
    %67 = vector.multi_reduction <add>, %66, %cst_32 [0] : vector<8x64xf32> to vector<64xf32>
    %68 = vector.shape_cast %67 : vector<64xf32> to vector<1x64xf32>
    %cst_33 = arith.constant 8.000000e+00 : f32
    %69 = vector.broadcast %cst_33 : f32 to vector<1x64xf32>
    %70 = arith.divf %68, %69 : vector<1x64xf32>
    %71 = tpu.concatenate %65, %70 in 0 : vector<1x64xf32>, vector<1x64xf32> -> vector<2x64xf32>
    %72 = arith.subf %60, %71 : vector<2x64xf32>
    %73 = arith.mulf %72, %72 : vector<2x64xf32>
    %74 = vector.shape_cast %73 : vector<2x64xf32> to vector<1x2x64xf32>
    %cst_34 = arith.constant dense<0.000000e+00> : vector<1xf32>
    %75 = vector.multi_reduction <add>, %74, %cst_34 [1, 2] : vector<1x2x64xf32> to vector<1xf32>
    %76 = vector.shape_cast %75 : vector<1xf32> to vector<1x1x1xf32>
    %77 = vector.extract %76[0, 0, 0] : f32 from vector<1x1x1xf32>
    %cst_35 = arith.constant 1.280000e+02 : f32
    %78 = arith.divf %77, %cst_35 : f32
    %79 = vector.broadcast %78 : f32 to vector<1x1xf32>
    %c0_36 = arith.constant 0 : index
    %c0_37 = arith.constant 0 : index
    %80 = vector.load %arg10[%c0_36, %c0_37] : memref<1x1xf32, #tpu.memory_space<vmem>>, vector<1x1xf32>
    tpu.vector_store %arg10[%c0_36, %c0_37], %79 {strides = array<i32>} : memref<1x1xf32, #tpu.memory_space<vmem>>, vector<1x1xf32>,
    return
  }
}

module attributes {stable_mosaic.version = 11 : i64} {
  func.func @layer_kernel(%arg0: i32, %arg1: i32, %arg2: memref<1x8x64xf32, #tpu.memory_space<vmem>>, %arg3: memref<1x1x8xf32, #tpu.memory_space<vmem>>, %arg4: memref<8x256xf32, #tpu.memory_space<vmem>>, %arg5: memref<1x1x64xf32, #tpu.memory_space<vmem>>, %arg6: memref<1x64x128xbf16, #tpu.memory_space<vmem>>, %arg7: memref<1x64x64xbf16, #tpu.memory_space<vmem>>, %arg8: memref<1x1x64xf32, #tpu.memory_space<vmem>>, %arg9: memref<1x64x256xbf16, #tpu.memory_space<vmem>>, %arg10: memref<1x128x64xbf16, #tpu.memory_space<vmem>>, %arg11: memref<1x8x64xf32, #tpu.memory_space<vmem>>, %arg12: memref<8x64xf32, #tpu.memory_space<vmem>>) attributes {dimension_semantics = [#tpu.dimension_semantics<parallel>, #tpu.dimension_semantics<arbitrary>], iteration_bounds = array<i64: 2, 2>, scalar_prefetch = 0 : i64, scratch_operands = 1 : i64, tpu.core_type = #tpu.core_type<tc>, window_params = [{transform_indices = @transform_0, window_bounds = array<i64: 1, 8, 64>}, {transform_indices = @transform_1, window_bounds = array<i64: 1, 1, 8>}, {pipeline_mode = #tpu.pipeline_mode<synchronous>, transform_indices = @transform_2, window_bounds = array<i64: 8, 256>}, {transform_indices = @transform_3, window_bounds = array<i64: 1, 1, 64>}, {transform_indices = @transform_4, window_bounds = array<i64: 1, 64, 128>}, {transform_indices = @transform_5, window_bounds = array<i64: 1, 64, 64>}, {transform_indices = @transform_6, window_bounds = array<i64: 1, 1, 64>}, {transform_indices = @transform_7, window_bounds = array<i64: 1, 64, 256>}, {transform_indices = @transform_8, window_bounds = array<i64: 1, 128, 64>}, {transform_indices = @transform_9, window_bounds = array<i64: 1, 8, 64>}]} {
    %c0_i32 = arith.constant 0 : i32
    %0 = arith.cmpi eq, %arg1, %c0_i32 : i32
    %1 = arith.extui %0 : i1 to i32
    %c0_i32_0 = arith.constant 0 : i32
    %2 = arith.cmpi ne, %1, %c0_i32_0 : i32
    scf.if %2 {
      %c0_61 = arith.constant 0 : index
      %c0_62 = arith.constant 0 : index
      %c0_63 = arith.constant 0 : index
      %148 = vector.load %arg2[%c0_61, %c0_62, %c0_63] : memref<1x8x64xf32, #tpu.memory_space<vmem>>, vector<1x8x64xf32>
      %c0_64 = arith.constant 0 : index
      %c0_65 = arith.constant 0 : index
      %c0_66 = arith.constant 0 : index
      %149 = vector.load %arg11[%c0_64, %c0_65, %c0_66] : memref<1x8x64xf32, #tpu.memory_space<vmem>>, vector<1x8x64xf32>
      tpu.vector_store %arg11[%c0_64, %c0_65, %c0_66], %148 {strides = array<i32>} : memref<1x8x64xf32, #tpu.memory_space<vmem>>, vector<1x8x64xf32>,
    } else {
    }
    %c0 = arith.constant 0 : index
    %c0_1 = arith.constant 0 : index
    %c0_2 = arith.constant 0 : index
    %3 = vector.load %arg11[%c0, %c0_1, %c0_2] : memref<1x8x64xf32, #tpu.memory_space<vmem>>, vector<1x8x64xf32>
    %4 = vector.shape_cast %3 : vector<1x8x64xf32> to vector<8x64xf32>
    %c0_3 = arith.constant 0 : index
    %c0_4 = arith.constant 0 : index
    %5 = vector.load %arg4[%c0_3, %c0_4] : memref<8x256xf32, #tpu.memory_space<vmem>>, vector<8x256xf32>
    %6 = vector.extract_strided_slice %5 {offsets = [0, 0], sizes = [8, 128], strides = [1, 1]} : vector<8x256xf32> to vector<8x128xf32>
    %7 = vector.extract_strided_slice %5 {offsets = [0, 128], sizes = [8, 128], strides = [1, 1]} : vector<8x256xf32> to vector<8x128xf32>
    %8 = tpu.iota {dimensions = array<i32: 0>} : vector<16x8xi32>
    %9 = tpu.iota {dimensions = array<i32: 1>} : vector<16x8xi32>
    %c8_i32 = arith.constant 8 : i32
    %10 = vector.broadcast %c8_i32 : i32 to vector<16x8xi32>
    %11 = arith.remsi %8, %10 : vector<16x8xi32>
    %12 = arith.cmpi sle, %9, %11 : vector<16x8xi32>
    %cst = arith.constant 0.000000e+00 : f32
    %cst_5 = arith.constant -1.000000e+09 : f32
    %13 = vector.broadcast %cst : f32 to vector<16x8xf32>
    %14 = vector.broadcast %cst_5 : f32 to vector<16x8xf32>
    %15 = arith.select %12, %13, %14 : vector<16x8xi1>, vector<16x8xf32>
    %c0_6 = arith.constant 0 : index
    %c0_7 = arith.constant 0 : index
    %c0_8 = arith.constant 0 : index
    %16 = vector.load %arg3[%c0_6, %c0_7, %c0_8] : memref<1x1x8xf32, #tpu.memory_space<vmem>>, vector<1x1x8xf32>
    %17 = vector.shape_cast %16 : vector<1x1x8xf32> to vector<1x8xf32>
    %18 = vector.broadcast %17 : vector<1x8xf32> to vector<16x8xf32>
    %19 = arith.addf %15, %18 : vector<16x8xf32>
    %c0_9 = arith.constant 0 : index
    %c0_10 = arith.constant 0 : index
    %c0_11 = arith.constant 0 : index
    %20 = vector.load %arg5[%c0_9, %c0_10, %c0_11] : memref<1x1x64xf32, #tpu.memory_space<vmem>>, vector<1x1x64xf32>
    %21 = vector.shape_cast %20 : vector<1x1x64xf32> to vector<1x64xf32>
    %22 = arith.mulf %4, %4 : vector<8x64xf32>
    %cst_12 = arith.constant dense<0.000000e+00> : vector<8xf32>
    %23 = vector.multi_reduction <add>, %22, %cst_12 [1] : vector<8x64xf32> to vector<8xf32>
    %24 = vector.shape_cast %23 : vector<8xf32> to vector<8x1xf32>
    %cst_13 = arith.constant 6.400000e+01 : f32
    %25 = vector.broadcast %cst_13 : f32 to vector<8x1xf32>
    %26 = arith.divf %24, %25 : vector<8x1xf32>
    %cst_14 = arith.constant 9.99999974E-6 : f32
    %27 = vector.broadcast %cst_14 : f32 to vector<8x1xf32>
    %28 = arith.addf %26, %27 : vector<8x1xf32>
    %29 = math.rsqrt %28 : vector<8x1xf32>
    %30 = vector.broadcast %29 : vector<8x1xf32> to vector<8x64xf32>
    %31 = arith.mulf %4, %30 : vector<8x64xf32>
    %32 = vector.broadcast %21 : vector<1x64xf32> to vector<8x64xf32>
    %33 = arith.mulf %31, %32 : vector<8x64xf32>
    %34 = arith.truncf %33 : vector<8x64xf32> to vector<8x64xbf16>
    %c0_15 = arith.constant 0 : index
    %c0_16 = arith.constant 0 : index
    %c0_17 = arith.constant 0 : index
    %35 = vector.load %arg6[%c0_15, %c0_16, %c0_17] : memref<1x64x128xbf16, #tpu.memory_space<vmem>>, vector<1x64x128xbf16>
    %36 = vector.shape_cast %35 : vector<1x64x128xbf16> to vector<64x128xbf16>
    %cst_18 = arith.constant dense<0.000000e+00> : vector<8x128xf32>
    %37 = tpu.matmul %34, %36, %cst_18 {dimension_numbers = #tpu.dot_dimension_numbers<[1], [0], [0], [1], [0, 0, 1, 1], [], []>} : vector<8x64xbf16>, vector<64x128xbf16>, vector<8x128xf32> -> vector<8x128xf32>
    %38 = tpu.iota {dimensions = array<i32: 1>} : vector<8x128xi32>
    %c16_i32 = arith.constant 16 : i32
    %39 = vector.broadcast %c16_i32 : i32 to vector<8x128xi32>
    %40 = arith.remsi %38, %39 : vector<8x128xi32>
    %c8_i32_19 = arith.constant 8 : i32
    %41 = vector.broadcast %c8_i32_19 : i32 to vector<8x128xi32>
    %42 = arith.cmpi sge, %40, %41 : vector<8x128xi32>
    %c8_i32_20 = arith.constant 8 : i32
    %43 = tpu.dynamic_rotate %37 by %c8_i32_20 dim 1 : vector<8x128xf32>, i32 -> vector<8x128xf32>
    %c120_i32 = arith.constant 120 : i32
    %44 = tpu.dynamic_rotate %37 by %c120_i32 dim 1 : vector<8x128xf32>, i32 -> vector<8x128xf32>
    %cst_21 = arith.constant 0.000000e+00 : f32
    %45 = vector.broadcast %cst_21 : f32 to vector<8x128xf32>
    %46 = arith.subf %45, %44 : vector<8x128xf32>
    %47 = arith.select %42, %43, %46 : vector<8x128xi1>, vector<8x128xf32>
    %48 = arith.mulf %37, %6 : vector<8x128xf32>
    %49 = arith.mulf %47, %7 : vector<8x128xf32>
    %50 = arith.addf %48, %49 : vector<8x128xf32>
    %51 = vector.extract_strided_slice %50 {offsets = [0, 64], sizes = [8, 32], strides = [1, 1]} : vector<8x128xf32> to vector<8x32xf32>
    %52 = arith.truncf %51 : vector<8x32xf32> to vector<8x32xbf16>
    %53 = vector.extract_strided_slice %37 {offsets = [0, 96], sizes = [8, 32], strides = [1, 1]} : vector<8x128xf32> to vector<8x32xf32>
    %54 = arith.truncf %53 : vector<8x32xf32> to vector<8x32xbf16>
    %55 = vector.extract_strided_slice %50 {offsets = [0, 0], sizes = [8, 16], strides = [1, 1]} : vector<8x128xf32> to vector<8x16xf32>
    %56 = vector.extract_strided_slice %50 {offsets = [0, 16], sizes = [8, 16], strides = [1, 1]} : vector<8x128xf32> to vector<8x16xf32>
    %57 = tpu.concatenate %55, %56 in 0 : vector<8x16xf32>, vector<8x16xf32> -> vector<16x16xf32>
    %58 = arith.truncf %57 : vector<16x16xf32> to vector<16x16xbf16>
    %59 = vector.extract_strided_slice %52 {offsets = [0, 0], sizes = [8, 16], strides = [1, 1]} : vector<8x32xbf16> to vector<8x16xbf16>
    %60 = vector.extract_strided_slice %54 {offsets = [0, 0], sizes = [8, 16], strides = [1, 1]} : vector<8x32xbf16> to vector<8x16xbf16>
    %cst_22 = arith.constant dense<0.000000e+00> : vector<16x8xf32>
    %61 = tpu.matmul %58, %59, %cst_22 {dimension_numbers = #tpu.dot_dimension_numbers<[1], [1], [0], [0], [0, 0, 1, 0], [], []>} : vector<16x16xbf16>, vector<8x16xbf16>, vector<16x8xf32> -> vector<16x8xf32>
    %cst_23 = arith.constant 2.500000e-01 : f32
    %62 = vector.broadcast %cst_23 : f32 to vector<16x8xf32>
    %63 = arith.mulf %61, %62 : vector<16x8xf32>
    %64 = arith.addf %63, %19 : vector<16x8xf32>
    %cst_24 = arith.constant dense<0xFF800000> : vector<16xf32>
    %65 = vector.multi_reduction <maximumf>, %64, %cst_24 [1] : vector<16x8xf32> to vector<16xf32>
    %66 = vector.shape_cast %65 : vector<16xf32> to vector<16x1xf32>
    %67 = vector.broadcast %66 : vector<16x1xf32> to vector<16x8xf32>
    %68 = arith.subf %64, %67 : vector<16x8xf32>
    %69 = math.exp %68 : vector<16x8xf32>
    %cst_25 = arith.constant dense<0.000000e+00> : vector<16xf32>
    %70 = vector.multi_reduction <add>, %69, %cst_25 [1] : vector<16x8xf32> to vector<16xf32>
    %71 = vector.shape_cast %70 : vector<16xf32> to vector<16x1xf32>
    %72 = tpu.reciprocal %71 {approx = true} : vector<16x1xf32> -> vector<16x1xf32>
    %73 = vector.broadcast %72 : vector<16x1xf32> to vector<16x8xf32>
    %74 = arith.mulf %69, %73 : vector<16x8xf32>
    %75 = arith.truncf %74 : vector<16x8xf32> to vector<16x8xbf16>
    %cst_26 = arith.constant dense<0.000000e+00> : vector<16x16xf32>
    %76 = tpu.matmul %75, %60, %cst_26 {dimension_numbers = #tpu.dot_dimension_numbers<[1], [0], [0], [1], [0, 0, 1, 1], [], []>} : vector<16x8xbf16>, vector<8x16xbf16>, vector<16x16xf32> -> vector<16x16xf32>
    %77 = vector.extract_strided_slice %76 {offsets = [0, 0], sizes = [8, 16], strides = [1, 1]} : vector<16x16xf32> to vector<8x16xf32>
    %c0_27 = arith.constant 0 : index
    %c0_28 = arith.constant 0 : index
    %78 = vector.load %arg12[%c0_27, %c0_28] : memref<8x64xf32, #tpu.memory_space<vmem>>, vector<8x16xf32>
    tpu.vector_store %arg12[%c0_27, %c0_28], %77 {strides = array<i32>} : memref<8x64xf32, #tpu.memory_space<vmem>>, vector<8x16xf32>,
    %79 = vector.extract_strided_slice %76 {offsets = [8, 0], sizes = [8, 16], strides = [1, 1]} : vector<16x16xf32> to vector<8x16xf32>
    %c0_29 = arith.constant 0 : index
    %c16 = arith.constant 16 : index
    %80 = vector.load %arg12[%c0_29, %c16] : memref<8x64xf32, #tpu.memory_space<vmem>>, vector<8x16xf32>
    tpu.vector_store %arg12[%c0_29, %c16], %79 {strides = array<i32>} : memref<8x64xf32, #tpu.memory_space<vmem>>, vector<8x16xf32>,
    %81 = vector.extract_strided_slice %50 {offsets = [0, 32], sizes = [8, 16], strides = [1, 1]} : vector<8x128xf32> to vector<8x16xf32>
    %82 = vector.extract_strided_slice %50 {offsets = [0, 48], sizes = [8, 16], strides = [1, 1]} : vector<8x128xf32> to vector<8x16xf32>
    %83 = tpu.concatenate %81, %82 in 0 : vector<8x16xf32>, vector<8x16xf32> -> vector<16x16xf32>
    %84 = arith.truncf %83 : vector<16x16xf32> to vector<16x16xbf16>
    %85 = vector.extract_strided_slice %52 {offsets = [0, 16], sizes = [8, 16], strides = [1, 1]} : vector<8x32xbf16> to vector<8x16xbf16>
    %86 = vector.extract_strided_slice %54 {offsets = [0, 16], sizes = [8, 16], strides = [1, 1]} : vector<8x32xbf16> to vector<8x16xbf16>
    %cst_30 = arith.constant dense<0.000000e+00> : vector<16x8xf32>
    %87 = tpu.matmul %84, %85, %cst_30 {dimension_numbers = #tpu.dot_dimension_numbers<[1], [1], [0], [0], [0, 0, 1, 0], [], []>} : vector<16x16xbf16>, vector<8x16xbf16>, vector<16x8xf32> -> vector<16x8xf32>
    %cst_31 = arith.constant 2.500000e-01 : f32
    %88 = vector.broadcast %cst_31 : f32 to vector<16x8xf32>
    %89 = arith.mulf %87, %88 : vector<16x8xf32>
    %90 = arith.addf %89, %19 : vector<16x8xf32>
    %cst_32 = arith.constant dense<0xFF800000> : vector<16xf32>
    %91 = vector.multi_reduction <maximumf>, %90, %cst_32 [1] : vector<16x8xf32> to vector<16xf32>
    %92 = vector.shape_cast %91 : vector<16xf32> to vector<16x1xf32>
    %93 = vector.broadcast %92 : vector<16x1xf32> to vector<16x8xf32>
    %94 = arith.subf %90, %93 : vector<16x8xf32>
    %95 = math.exp %94 : vector<16x8xf32>
    %cst_33 = arith.constant dense<0.000000e+00> : vector<16xf32>
    %96 = vector.multi_reduction <add>, %95, %cst_33 [1] : vector<16x8xf32> to vector<16xf32>
    %97 = vector.shape_cast %96 : vector<16xf32> to vector<16x1xf32>
    %98 = tpu.reciprocal %97 {approx = true} : vector<16x1xf32> -> vector<16x1xf32>
    %99 = vector.broadcast %98 : vector<16x1xf32> to vector<16x8xf32>
    %100 = arith.mulf %95, %99 : vector<16x8xf32>
    %101 = arith.truncf %100 : vector<16x8xf32> to vector<16x8xbf16>
    %cst_34 = arith.constant dense<0.000000e+00> : vector<16x16xf32>
    %102 = tpu.matmul %101, %86, %cst_34 {dimension_numbers = #tpu.dot_dimension_numbers<[1], [0], [0], [1], [0, 0, 1, 1], [], []>} : vector<16x8xbf16>, vector<8x16xbf16>, vector<16x16xf32> -> vector<16x16xf32>
    %103 = vector.extract_strided_slice %102 {offsets = [0, 0], sizes = [8, 16], strides = [1, 1]} : vector<16x16xf32> to vector<8x16xf32>
    %c0_35 = arith.constant 0 : index
    %c32 = arith.constant 32 : index
    %104 = vector.load %arg12[%c0_35, %c32] : memref<8x64xf32, #tpu.memory_space<vmem>>, vector<8x16xf32>
    tpu.vector_store %arg12[%c0_35, %c32], %103 {strides = array<i32>} : memref<8x64xf32, #tpu.memory_space<vmem>>, vector<8x16xf32>,
    %105 = vector.extract_strided_slice %102 {offsets = [8, 0], sizes = [8, 16], strides = [1, 1]} : vector<16x16xf32> to vector<8x16xf32>
    %c0_36 = arith.constant 0 : index
    %c48 = arith.constant 48 : index
    %106 = vector.load %arg12[%c0_36, %c48] : memref<8x64xf32, #tpu.memory_space<vmem>>, vector<8x16xf32>
    tpu.vector_store %arg12[%c0_36, %c48], %105 {strides = array<i32>} : memref<8x64xf32, #tpu.memory_space<vmem>>, vector<8x16xf32>,
    %c0_37 = arith.constant 0 : index
    %c0_38 = arith.constant 0 : index
    %107 = vector.load %arg12[%c0_37, %c0_38] : memref<8x64xf32, #tpu.memory_space<vmem>>, vector<8x64xf32>
    %108 = arith.truncf %107 : vector<8x64xf32> to vector<8x64xbf16>
    %c0_39 = arith.constant 0 : index
    %c0_40 = arith.constant 0 : index
    %c0_41 = arith.constant 0 : index
    %109 = vector.load %arg7[%c0_39, %c0_40, %c0_41] : memref<1x64x64xbf16, #tpu.memory_space<vmem>>, vector<1x64x64xbf16>
    %110 = vector.shape_cast %109 : vector<1x64x64xbf16> to vector<64x64xbf16>
    %cst_42 = arith.constant dense<0.000000e+00> : vector<8x64xf32>
    %111 = tpu.matmul %108, %110, %cst_42 {dimension_numbers = #tpu.dot_dimension_numbers<[1], [0], [0], [1], [0, 0, 1, 1], [], []>} : vector<8x64xbf16>, vector<64x64xbf16>, vector<8x64xf32> -> vector<8x64xf32>
    %112 = arith.addf %4, %111 : vector<8x64xf32>
    %c0_43 = arith.constant 0 : index
    %c0_44 = arith.constant 0 : index
    %c0_45 = arith.constant 0 : index
    %113 = vector.load %arg8[%c0_43, %c0_44, %c0_45] : memref<1x1x64xf32, #tpu.memory_space<vmem>>, vector<1x1x64xf32>
    %114 = vector.shape_cast %113 : vector<1x1x64xf32> to vector<1x64xf32>
    %115 = arith.mulf %112, %112 : vector<8x64xf32>
    %cst_46 = arith.constant dense<0.000000e+00> : vector<8xf32>
    %116 = vector.multi_reduction <add>, %115, %cst_46 [1] : vector<8x64xf32> to vector<8xf32>
    %117 = vector.shape_cast %116 : vector<8xf32> to vector<8x1xf32>
    %cst_47 = arith.constant 6.400000e+01 : f32
    %118 = vector.broadcast %cst_47 : f32 to vector<8x1xf32>
    %119 = arith.divf %117, %118 : vector<8x1xf32>
    %cst_48 = arith.constant 9.99999974E-6 : f32
    %120 = vector.broadcast %cst_48 : f32 to vector<8x1xf32>
    %121 = arith.addf %119, %120 : vector<8x1xf32>
    %122 = math.rsqrt %121 : vector<8x1xf32>
    %123 = vector.broadcast %122 : vector<8x1xf32> to vector<8x64xf32>
    %124 = arith.mulf %112, %123 : vector<8x64xf32>
    %125 = vector.broadcast %114 : vector<1x64xf32> to vector<8x64xf32>
    %126 = arith.mulf %124, %125 : vector<8x64xf32>
    %127 = arith.truncf %126 : vector<8x64xf32> to vector<8x64xbf16>
    %c0_49 = arith.constant 0 : index
    %c0_50 = arith.constant 0 : index
    %c0_51 = arith.constant 0 : index
    %128 = vector.load %arg9[%c0_49, %c0_50, %c0_51] : memref<1x64x256xbf16, #tpu.memory_space<vmem>>, vector<1x64x256xbf16>
    %129 = vector.shape_cast %128 : vector<1x64x256xbf16> to vector<64x256xbf16>
    %cst_52 = arith.constant dense<0.000000e+00> : vector<8x256xf32>
    %130 = tpu.matmul %127, %129, %cst_52 {dimension_numbers = #tpu.dot_dimension_numbers<[1], [0], [0], [1], [0, 0, 1, 1], [], []>} : vector<8x64xbf16>, vector<64x256xbf16>, vector<8x256xf32> -> vector<8x256xf32>
    %131 = vector.extract_strided_slice %130 {offsets = [0, 0], sizes = [8, 128], strides = [1, 1]} : vector<8x256xf32> to vector<8x128xf32>
    %132 = vector.extract_strided_slice %130 {offsets = [0, 128], sizes = [8, 128], strides = [1, 1]} : vector<8x256xf32> to vector<8x128xf32>
    %133 = arith.negf %131 : vector<8x128xf32>
    %134 = math.exp %133 : vector<8x128xf32>
    %cst_53 = arith.constant 1.000000e+00 : f32
    %135 = vector.broadcast %cst_53 : f32 to vector<8x128xf32>
    %136 = arith.addf %135, %134 : vector<8x128xf32>
    %137 = arith.divf %135, %136 : vector<8x128xf32>
    %138 = arith.mulf %131, %137 : vector<8x128xf32>
    %139 = arith.mulf %138, %132 : vector<8x128xf32>
    %140 = arith.truncf %139 : vector<8x128xf32> to vector<8x128xbf16>
    %c0_54 = arith.constant 0 : index
    %c0_55 = arith.constant 0 : index
    %c0_56 = arith.constant 0 : index
    %141 = vector.load %arg10[%c0_54, %c0_55, %c0_56] : memref<1x128x64xbf16, #tpu.memory_space<vmem>>, vector<1x128x64xbf16>
    %142 = vector.shape_cast %141 : vector<1x128x64xbf16> to vector<128x64xbf16>
    %cst_57 = arith.constant dense<0.000000e+00> : vector<8x64xf32>
    %143 = tpu.matmul %140, %142, %cst_57 {dimension_numbers = #tpu.dot_dimension_numbers<[1], [0], [0], [1], [0, 0, 1, 1], [], []>} : vector<8x128xbf16>, vector<128x64xbf16>, vector<8x64xf32> -> vector<8x64xf32>
    %144 = arith.addf %112, %143 : vector<8x64xf32>
    %c0_58 = arith.constant 0 : index
    %c0_59 = arith.constant 0 : index
    %c0_60 = arith.constant 0 : index
    %145 = vector.load %arg11[%c0_58, %c0_59, %c0_60] : memref<1x8x64xf32, #tpu.memory_space<vmem>>, vector<1x8x64xf32>
    %146 = vector.shape_cast %145 : vector<1x8x64xf32> to vector<8x64xf32>
    %147 = vector.shape_cast %144 : vector<8x64xf32> to vector<1x8x64xf32>
    tpu.vector_store %arg11[%c0_58, %c0_59, %c0_60], %147 {strides = array<i32>} : memref<1x8x64xf32, #tpu.memory_space<vmem>>, vector<1x8x64xf32>,
    return
  }
  func.func @transform_0(%arg0: i32, %arg1: i32) -> (i32, i32, i32) {
    %c0_i32 = arith.constant 0 : i32
    %c0_i32_0 = arith.constant 0 : i32
    %c0_i32_1 = arith.constant 0 : i32
    return %arg0, %c0_i32, %c0_i32_0 : i32, i32, i32
  }
  func.func @transform_1(%arg0: i32, %arg1: i32) -> (i32, i32, i32) {
    %c0_i32 = arith.constant 0 : i32
    %c0_i32_0 = arith.constant 0 : i32
    %c0_i32_1 = arith.constant 0 : i32
    return %arg0, %c0_i32, %c0_i32_0 : i32, i32, i32
  }
  func.func @transform_2(%arg0: i32, %arg1: i32) -> (i32, i32) {
    %c0_i32 = arith.constant 0 : i32
    %c0_i32_0 = arith.constant 0 : i32
    %c0_i32_1 = arith.constant 0 : i32
    return %c0_i32, %c0_i32_0 : i32, i32
  }
  func.func @transform_3(%arg0: i32, %arg1: i32) -> (i32, i32, i32) {
    %c0_i32 = arith.constant 0 : i32
    %c0_i32_0 = arith.constant 0 : i32
    %c0_i32_1 = arith.constant 0 : i32
    return %arg1, %c0_i32, %c0_i32_0 : i32, i32, i32
  }
  func.func @transform_4(%arg0: i32, %arg1: i32) -> (i32, i32, i32) {
    %c0_i32 = arith.constant 0 : i32
    %c0_i32_0 = arith.constant 0 : i32
    %c0_i32_1 = arith.constant 0 : i32
    return %arg1, %c0_i32, %c0_i32_0 : i32, i32, i32
  }
  func.func @transform_5(%arg0: i32, %arg1: i32) -> (i32, i32, i32) {
    %c0_i32 = arith.constant 0 : i32
    %c0_i32_0 = arith.constant 0 : i32
    %c0_i32_1 = arith.constant 0 : i32
    return %arg1, %c0_i32, %c0_i32_0 : i32, i32, i32
  }
  func.func @transform_6(%arg0: i32, %arg1: i32) -> (i32, i32, i32) {
    %c0_i32 = arith.constant 0 : i32
    %c0_i32_0 = arith.constant 0 : i32
    %c0_i32_1 = arith.constant 0 : i32
    return %arg1, %c0_i32, %c0_i32_0 : i32, i32, i32
  }
  func.func @transform_7(%arg0: i32, %arg1: i32) -> (i32, i32, i32) {
    %c0_i32 = arith.constant 0 : i32
    %c0_i32_0 = arith.constant 0 : i32
    %c0_i32_1 = arith.constant 0 : i32
    return %arg1, %c0_i32, %c0_i32_0 : i32, i32, i32
  }
  func.func @transform_8(%arg0: i32, %arg1: i32) -> (i32, i32, i32) {
    %c0_i32 = arith.constant 0 : i32
    %c0_i32_0 = arith.constant 0 : i32
    %c0_i32_1 = arith.constant 0 : i32
    return %arg1, %c0_i32, %c0_i32_0 : i32, i32, i32
  }
  func.func @transform_9(%arg0: i32, %arg1: i32) -> (i32, i32, i32) {
    %c0_i32 = arith.constant 0 : i32
    %c0_i32_0 = arith.constant 0 : i32
    %c0_i32_1 = arith.constant 0 : i32
    return %arg0, %c0_i32, %c0_i32_0 : i32, i32, i32
  }
}

</mosaic_0001>

<bundles_post_ra>
// kernel: tile.26
= control target key start
LH: loop header
LB: loop body
LE: loop exit
PB: predicated region body
PF: predicated region fallthrough
CT: control target
= control target key end

     0   :  { %vm4_vm0 = vcmask 1047556   ;;  %s73_s14 = smov 80   ;;  %s74_s17 = smov 48   ;;  %vm6_vm1 = vcmask 130048   ;;  %vm16_vm2 = vcmask 786048   ;;  %vm26_vm3 = vcmask 654848   ;;  %s148_s0 = inlined_call_operand.vmem [shape: f32[8,6,16], index: 0, kind: input, shape index: {}]   ;;  %s149_s1 = inlined_call_operand.vmem [shape: f32[8,96], index: 1, kind: output, shape index: {}]  }
   0x1   :  { %v58_v0 = vld [vmem:[%s148_s0 + $0x5] ss:$8 sm:$0xf]   ;;  %v62_v3 = vld [vmem:[%s148_s0 + $0x3] ss:$8 sm:$0xf]  }
   0x2   :  { %v59_v1 = vld [vmem:[%s148_s0 + $0x5] ss:$8 sm:$0xf0]   ;;  %v63_v4 = vld [vmem:[%s148_s0 + $0x3] ss:$8 sm:$0xf0]  }
   0x3   :  { %v13_v2 = vsel %vm4_vm0, %v59_v1, %v58_v0  ;;  %v33_v5 = vsel %vm4_vm0, %v63_v4, %v62_v3  ;;  %v60_v6 = vld [vmem:[%s148_s0 + $0x4] ss:$8 sm:$0xf]   ;;  %v64_v8 = vld [vmem:[%s148_s0 + $0x2] ss:$8 sm:$0xf]  }
   0x4   :  { %14 = vrot.lane.b32.xlu0 %v13_v2, %s73_s14  ;;  %34 = vrot.lane.b32.xlu1 %v33_v5, %s74_s17  ;;  %v61_v7 = vld [vmem:[%s148_s0 + $0x4] ss:$8 sm:$0xf0]   ;;  %v65_v9 = vld [vmem:[%s148_s0 + $0x2] ss:$8 sm:$0xf0]  }
   0x5   :  { %v66_v10 = vld [vmem:[%s148_s0 + $0x1] ss:$8 sm:$0xf]   ;;  %v23_v13 = vsel %vm4_vm0, %v61_v7, %v60_v6  ;;  %s75_s28 = smov 16   ;;  %v43_v14 = vsel %vm4_vm0, %v65_v9, %v64_v8  ;;  %s76_s29 = smov 64   ;;  %vm36_vm4 = vcmask 523648  }
   0x6   :  { %v67_v11 = vld [vmem:[%s148_s0 + $0x1] ss:$8 sm:$0xf0]   ;;  %s77_s30 = smov 32   ;;  %vm46_vm5 = vcmask 392448   ;;  %vm56_vm6 = vcmask 261248  }
   0x7   :  { %v53_v12 = vsel %vm4_vm0, %v67_v11, %v66_v10  ;;  %v2_v15 = vld [vmem:[%s148_s0] ss:$8 sm:$0xf]  }
   0x8   :  { %54 = vrot.lane.b32.xlu2 %v53_v12, %s75_s28  ;;  %v3_v16 = vld [vmem:[%s148_s0] ss:$8 sm:$0xf0]  }
   0x9   :  { %v5_v17 = vsel %vm4_vm0, %v3_v16, %v2_v15 }
   0xa   :  { %7 = vst.msk [vmem:[%s149_s1] sm:$0xff] %vm6_vm1, %v5_v17  }
   0xc   :  { %24 = vrot.lane.b32.xlu0 %v23_v13, %s76_s29  ;;  %44 = vrot.lane.b32.xlu1 %v43_v14, %s77_s30 }
  0x62   :  { %v55_v18 = vpop.permute.xlu2 %54  }
  0x76   :  { %v15_v19 = vpop.permute.xlu0 %14   ;;  %v35_v20 = vpop.permute.xlu1 %34  }
  0x77   :  { %17 = vst.msk [vmem:[%s149_s1] sm:$0xff] %vm16_vm2, %v15_v19  }
  0x7e   :  { %v25_v21 = vpop.permute.xlu0 %24   ;;  %v45_v22 = vpop.permute.xlu1 %44  }
  0x7f   :  { %27 = vst.msk [vmem:[%s149_s1] sm:$0xff] %vm26_vm3, %v25_v21  }
  0x80   :  { %37 = vst.msk [vmem:[%s149_s1] sm:$0xff] %vm36_vm4, %v35_v20  }
  0x81   :  { %47 = vst.msk [vmem:[%s149_s1] sm:$0xff] %vm46_vm5, %v45_v22  }
  0x82   :  { %57 = vst.msk [vmem:[%s149_s1] sm:$0xff] %vm56_vm6, %v55_v18  }

// kernel: full_model_forward.3
= control target key start
LH: loop header
LB: loop body
LE: loop exit
PB: predicated region body
PF: predicated region fallthrough
CT: control target
= control target key end

     0   :  { %16 = vsyncpa [#allocation3], 0  ;;  %s735_s0 = inlined_call_operand.vmem [shape: f32[16,64], index: 0, kind: input, shape index: {}]   ;;  %s736_s1 = inlined_call_operand.vmem [shape: f32[1,64], index: 1, kind: input, shape index: {}]   ;;  %s737_s2 = inlined_call_operand.vmem [shape: bf16[64,128], index: 2, kind: input, shape index: {}]   ;;  %s738_s3 = inlined_call_operand.vmem [shape: s32[16,1], index: 3, kind: input, shape index: {}]   ;;  %s739_s4 = inlined_call_operand.vmem [shape: f32[2,48], index: 4, kind: input, shape index: {}]   ;;  %s740_s5 = inlined_call_operand.vmem [shape: bf16[48,64], index: 5, kind: input, shape index: {}]   ;;  %s741_s6 = inlined_call_operand.vmem [shape: f32[1,64], index: 6, kind: input, shape index: {}]   ;;  %s742_s7 = inlined_call_operand.hbm [shape: f32[16,64], index: 7, kind: output, shape index: {0}]   ;;  %s743_s8 = inlined_call_operand.hbm [shape: f32[16,128], index: 8, kind: output, shape index: {1}]   ;;  %s744_s9 = inlined_call_operand.hbm [shape: f32[1,1], index: 9, kind: output, shape index: {2}]   ;;  %s745_s10 = inlined_call_operand.hbm [shape: f32[1,1], index: 10, kind: output, shape index: {3}]  }
   0x1   :  { %17 = vsyncpa [#allocation5], 0  ;;  %v652_v0 = vld [vmem:[%s735_s0] sm:$0xff]  ;;  %vm39_vm0 = vcmask 523264   ;;  %v433_v1 = vld [vmem:[%s740_s5 + $0x10] sm:$0xff] }
   0x2   :  { %v37_v2 = vmul.f32 %v652_v0, %v652_v0  ;;  %v662_v3 = vld [vmem:[%s735_s0 + $0x8] sm:$0xff]  ;;  %271 = vmatpush.bf16.msra.mxu1 %v433_v1 }
   0x3   :  { %v432_v4 = vld [vmem:[%s740_s5 + $0x8] sm:$0xff] }
   0x4   :  { %18 = vsyncpa [#allocation8], 0  ;;  %v40_v5 = vsel %vm39_vm0, %v37_v2, 0.0  ;;  %v38_v6 = vmul.f32 %v662_v3, %v662_v3  ;;  %v431_v7 = vld [vmem:[%s740_s5] sm:$0xff]  ;;  %vm262_vm1 = vcmask 392192   ;;  %v582_v11 = vmov 64.0  }
   0x5   :  { %41 = vadd.xlane.f32.xlu0 %v40_v5  ;;  %v232_v8 = vld [vmem:[%s739_s4] sm:$0x3]  ;;  %460 = vrcp.f32 %v582_v11  ;;  %v430_v15 = vld [vmem:[%s737_s2 + $0x18] sm:$0xff]  ;;  %v429_v17 = vld [vmem:[%s737_s2 + $0x10] sm:$0xff]  ;;  %v583_v38 = vmov 8.0   ;;  %v584_v39 = vmov 0  }
   0x6   :  { %272 = vmatpush.bf16.msra.mxu1 %v432_v4  ;;  %v43_v9 = vsel %vm39_vm0, %v38_v6, 0.0  ;;  %v233_v10 = vpack.c.bf16 %v232_v8, %v232_v8  ;;  %126 = vmatpush.bf16.msra.mxu0 %v430_v15  ;;  %v428_v19 = vld [vmem:[%s737_s2 + $0x8] sm:$0xff]  ;;  %v427_v21 = vld [vmem:[%s737_s2] sm:$0xff]  ;;  %vm302_vm10 = vcmask 1040384   ;;  %vm186_vm15 = vcmask 7168   ;;  %s347_s18 = sshll.u32 %s743_s8, 4  ;;  %s348_s18 = int_to_ptr.hbm [resolvable:$true] %s347_s18 }
   0x7   :  { %v692_v35 = vld [vmem:[%s738_s3] sm:$0xff]  ;;  %456 = vset.pattern.permute.xlu2 %v584_v39  ;;  %457 = vset.pattern.permute.xlu0 %v584_v39  ;;  %v702_v48 = vld [vmem:[%s738_s3 + $0x8] sm:$0xff]  ;;  %s587_s19 = smov 128   ;;  %s588_s20 = smov 8  }
   0x8   :  { %v458_v40 = vld [vmem:[%s736_s1] ss:$0 sm:$0xff]  ;;  %163 = vperm.xlu2 %456, %v692_v35   ;;  %vm176_vm13 = vcmp.ne.s32.totalorder %v692_v35, 4294967196  ;;  %vm177_vm14 = vcmp.ne.s32.totalorder %v702_v48, 4294967196  ;;  %s334_s23 = sshll.u32 %s742_s7, 4  ;;  %s589_s0 = smov [#allocation2]   ;;  %s335_s23 = int_to_ptr.hbm [resolvable:$true] %s334_s23 }
   0x9   :  { %s332_s24 = sshll.u32 %s589_s0, 4  ;;  %s591_s5 = smov 1.0   ;;  %s333_s24 = int_to_ptr.vmem [resolvable:$true] %s332_s24 }
   0xa   :  { %273 = vmatpush.bf16.msra.mxu1 %v431_v7  ;;  %127 = vmatpush.bf16.msra.mxu0 %v429_v17  ;;  %s592_s7 = smov [#allocation6]   ;;  %s361_s29 = sshll.u32 %s744_s9, 4  ;;  %s362_s29 = int_to_ptr.hbm [resolvable:$true] %s361_s29 }
   0xb   :  { %v461_v12 = vpop.eup %460  ;;  %s359_s26 = sshll.u32 %s592_s7, 4  ;;  %s372_s2 = sshll.u32 %s745_s10, 4  ;;  %s360_s26 = int_to_ptr.vmem [resolvable:$true] %s359_s26  ;;  %s373_s2 = int_to_ptr.hbm [resolvable:$true] %s372_s2 }
   0xc   :  { %v47_v13 = vmul.f32 64.0, %v461_v12  ;;  %vm51_vm2 = vweird.f32 %v461_v12  ;;  %s593_s13 = smov [#allocation7]  }
   0xd   :  { %44 = vadd.xlane.f32.xlu0 %v43_v9  ;;  %426 = vmatmul.msk.bf16.vlgmr.msra.gmra.mxu1 %vm262_vm1, %v233_v10  ;;  %s370_s14 = sshll.u32 %s593_s13, 4  ;;  %s371_s14 = int_to_ptr.vmem [resolvable:$true] %s370_s14 }
   0xe   :  { %v48_v14 = vsub.f32 1.0, %v47_v13  ;;  %128 = vmatpush.bf16.msra.mxu0 %v428_v19 }
  0x10   :  { %v49_v16 = vmul.f32 %v461_v12, %v48_v14  ;;  %166 = vperm.xlu2 %456, %v702_v48  }
  0x12   :  { %v50_v18 = vadd.f32 %v461_v12, %v49_v16  ;;  %129 = vmatpush.bf16.msra.mxu0 %v427_v21  ;;  %v160_v16 = vlaneseq }
  0x14   :  { %v52_v20 = vsel %vm51_vm2, %v461_v12, %v50_v18  ;;  %v161_v17 = vand.u32 127, %v160_v16 }
  0x62   :  { %v164_v18 = vpop.permute.xlu2 %163 }
  0x63   :  { %vm168_vm11 = vcmp.eq.s32.totalorder %v161_v17, %v164_v18 }
  0x78   :  { %v42_v22 = vpop.xlane.xlu0 %41 }
  0x79   :  { %v53_v23 = vmul.f32 %v52_v20, %v42_v22 }
  0x7b   :  { %v55_v24 = vadd.f32 1e-05, %v53_v23 }
  0x7d   :  { %462 = vrsqrt.f32 %v55_v24  ;;  %vm63_vm4 = vweird.f32 %v55_v24 }
  0x80   :  { %v45_v25 = vpop.xlane.xlu0 %44 }
  0x81   :  { %v54_v26 = vmul.f32 %v52_v20, %v45_v25 }
  0x83   :  { %v463_v27 = vpop.eup %462  ;;  %v56_v28 = vadd.f32 1e-05, %v54_v26 }
  0x84   :  { %v58_v29 = vmul.f32 %v463_v27, %v55_v24  ;;  %vm64_vm3 = vweird.f32 %v463_v27 }
  0x85   :  { %464 = vrsqrt.f32 %v56_v28  ;;  %vm65_vm5 = vmor %vm63_vm4, %vm64_vm3  ;;  %vm73_vm7 = vweird.f32 %v56_v28 }
  0x86   :  { %v59_v30 = vmul.f32 %v463_v27, %v58_v29  ;;  %466 = vrcp.f32 %v583_v38  ;;  %v167_v29 = vpop.permute.xlu2 %166 }
  0x87   :  { %vm169_vm12 = vcmp.eq.s32.totalorder %v161_v17, %v167_v29 }
  0x88   :  { %v60_v31 = vmul.f32 0.5, %v59_v30 }
  0x8a   :  { %v61_v32 = vsub.f32 1.5, %v60_v31  ;;  %v275_v34 = vpop.f32.mrf.mxu1 }
  0x8b   :  { %v465_v33 = vpop.eup %464 }
  0x8c   :  { %v62_v36 = vmul.f32 %v463_v27, %v61_v32  ;;  %v68_v37 = vmul.f32 %v465_v33, %v56_v28  ;;  %v467_v46 = vpop.eup %466  ;;  %vm74_vm6 = vweird.f32 %v465_v33  ;;  %v585_v32 = vmov 0.0  }
  0x8d   :  { %vm75_vm8 = vmor %vm73_vm7, %vm74_vm6  ;;  %v287_v53 = vmul.f32 8.0, %v467_v46  ;;  %vm291_vm9 = vweird.f32 %v467_v46  ;;  %vm230_vm6 = vcmask 0  }
  0x8e   :  { %v66_v41 = vsel %vm65_vm5, %v463_v27, %v62_v36  ;;  %v69_v42 = vmul.f32 %v465_v33, %v68_v37 }
  0x8f   :  { %v77_v43 = vmul.f32 %v66_v41, %v652_v0  ;;  %v288_v59 = vsub.f32 1.0, %v287_v53 }
  0x90   :  { %v70_v44 = vmul.f32 0.5, %v69_v42 }
  0x91   :  { %v82_v45 = vmul.f32 %v458_v40, %v77_v43  ;;  %v289_v0 = vmul.f32 %v467_v46, %v288_v59 }
  0x92   :  { %v71_v47 = vsub.f32 1.5, %v70_v44  ;;  %v277_v50 = vpop.f32.mrf.mxu1 }
  0x93   :  { %v279_v49 = vsel %vm39_vm0, %v82_v45, 0.0  ;;  %84 = vst.msk [vmem:[#allocation2] sm:$0xff] %vm39_vm0, %v82_v45  ;;  %v290_v5 = vadd.f32 %v467_v46, %v289_v0 }
  0x94   :  { %v72_v51 = vmul.f32 %v465_v33, %v71_v47  ;;  %v280_v52 = vrot.slane %v279_v49, 4 }
  0x95   :  { %v292_v9 = vsel %vm291_vm9, %v467_v46, %v290_v5 }
  0x96   :  { %v76_v54 = vsel %vm75_vm8, %v465_v33, %v72_v51  ;;  %v281_v55 = vadd.f32 %v280_v52, %v279_v49  ;;  %v412_v33 = vsel %vm176_vm13, 1.0, %v585_v32 }
  0x97   :  { %v78_v56 = vmul.f32 %v76_v54, %v662_v3  ;;  %v459_v3 = vld [vmem:[%s741_s6] ss:$0 sm:$0xff]  ;;  %v199_v36 = vsel %vm186_vm15, %v412_v33, 0.0  ;;  %s586_s6 = smov [#allocation4]  }
  0x98   :  { %v282_v57 = vrot.slane %v281_v55, 2  ;;  %v276_v11 = vadd.f32 %v459_v3, %v275_v34  ;;  %v413_v34 = vsel %vm177_vm14, 1.0, %v585_v32  ;;  %s345_s15 = sshll.u32 %s586_s6, 4  ;;  %s346_s15 = int_to_ptr.vmem [resolvable:$true] %s345_s15 }
  0x99   :  { %v83_v58 = vmul.f32 %v458_v40, %v78_v56  ;;  %v200_v37 = vsel %vm186_vm15, %v413_v34, 0.0 }
  0x9a   :  { %v283_v63 = vadd.f32 %v282_v57, %v281_v55  ;;  %v201_v38 = vadd.f32 %v200_v37, %v199_v36 }
  0x9b   :  { %v86_v60 = vpack.c.bf16 %v83_v58, %v82_v45  ;;  %v294_v61 = vsel %vm39_vm0, %v83_v58, 0.0  ;;  %85 = vst.msk [vmem:[#allocation2 + $0x8] sm:$0xff] %vm39_vm0, %v83_v58 }
  0x9c   :  { %v295_v62 = vrot.slane %v294_v61, 4  ;;  %v284_v2 = vrot.slane %v283_v63, 1  ;;  %340 = dma.vmem_to_hbm [thread:$0]  %s333_s24, 256, %s335_s23, [#allocation3], %s587_s19, %s587_s19, %s588_s20  }
  0x9d   :  { %411 = vmatmul.msk.bf16.vlgmr.msra.gmra.mxu0 %vm39_vm0, %v86_v60  ;;  %vm306_vm0 = vcmask 517120  }
  0x9e   :  { %v296_v1 = vadd.f32 %v295_v62, %v294_v61  ;;  %v285_v7 = vadd.f32 %v284_v2, %v283_v63 }
  0xa0   :  { %v297_v4 = vrot.slane %v296_v1, 2  ;;  %v293_v12 = vmul.f32 %v292_v9, %v285_v7  ;;  %v590_v7 = vmov 128.0  }
  0xa2   :  { %v298_v6 = vadd.f32 %v297_v4, %v296_v1 }
  0xa4   :  { %v299_v8 = vrot.slane %v298_v6, 1 }
  0xa6   :  { %v300_v10 = vadd.f32 %v299_v8, %v298_v6 }
  0xa8   :  { %v301_v13 = vmul.f32 %v300_v10, %v292_v9 }
  0xaa   :  { %v303_v14 = vsel %vm302_vm10, %v293_v12, %v301_v13 }
  0xab   :  { %v304_v15 = vsub.f32 %v276_v11, %v303_v14 }
  0xad   :  { %v305_v55 = vmul.f32 %v304_v15, %v304_v15 }
  0xaf   :  { %v307_v56 = vsel %vm306_vm0, %v305_v55, 0.0 }
 0x11a   :  { %v131_v19 = vpop.f32.mrf.mxu0 }
 0x11b   :  { %136 = vst [vmem:[#allocation4] sm:$0xff] %v131_v19  ;;  %140 = vmax.xlane.f32.xlu1 %v131_v19  ;;  %v170_v20 = vsel %vm168_vm11, %v131_v19, 0.0 }
 0x11c   :  { %172 = vadd.xlane.f32.xlu2 %v170_v20 }
 0x122   :  { %v133_v21 = vpop.f32.mrf.mxu0 }
 0x123   :  { %137 = vst [vmem:[#allocation4 + $0x8] sm:$0xff] %v133_v21  ;;  %142 = vmax.xlane.f32.xlu1 %v133_v21  ;;  %v171_v31 = vsel %vm169_vm12, %v133_v21, 0.0 }
 0x124   :  { %353 = dma.vmem_to_hbm [thread:$0]  %s346_s15, 256, %s348_s18, [#allocation5], %s587_s19, %s587_s19, %s588_s20  }
 0x18e   :  { %v141_v22 = vpop.xlane.xlu1 %140 }
 0x18f   :  { %v144_v23 = vsub.f32 %v131_v19, %v141_v22  ;;  %v173_v44 = vpop.xlane.xlu2 %172 }
 0x191   :  { %v146_v24 = vmul.f32 1.442695, %v144_v23 }
 0x193   :  { %468 = vpow2.f32 %v146_v24 }
 0x196   :  { %v143_v25 = vpop.xlane.xlu1 %142 }
 0x197   :  { %v145_v26 = vsub.f32 %v133_v21, %v143_v25 }
 0x199   :  { %v469_v27 = vpop.eup %468  ;;  %v148_v28 = vmul.f32 1.442695, %v145_v26 }
 0x19a   :  { %150 = vadd.xlane.f32.xlu0 %v469_v27 }
 0x19b   :  { %470 = vpow2.f32 %v148_v28 }
 0x1a1   :  { %v471_v30 = vpop.eup %470 }
 0x1a2   :  { %152 = vadd.xlane.f32.xlu1 %v471_v30  ;;  %174 = vadd.xlane.f32.xlu0 %v171_v31 }
 0x1aa   :  { %202 = vadd.xlane.f32.xlu0 %v201_v38 }
 0x20d   :  { %v151_v39 = vpop.xlane.xlu0 %150 }
 0x20e   :  { %472 = vlog2.f32 %v151_v39 }
 0x214   :  { %v473_v40 = vpop.eup %472 }
 0x215   :  { %v155_v41 = vmul.f32 0.6931472, %v473_v40  ;;  %v153_v42 = vpop.xlane.xlu1 %152  ;;  %v175_v48 = vpop.xlane.xlu0 %174 }
 0x216   :  { %474 = vlog2.f32 %v153_v42 }
 0x217   :  { %v158_v43 = vadd.f32 %v155_v41, %v141_v22  ;;  %476 = vrcp.f32 %v590_v7 }
 0x219   :  { %v182_v45 = vsub.f32 %v158_v43, %v173_v44 }
 0x21b   :  { %v184_v50 = vmul.f32 %v412_v33, %v182_v45 }
 0x21c   :  { %v475_v35 = vpop.eup %474 }
 0x21d   :  { %v157_v46 = vmul.f32 0.6931472, %v475_v35  ;;  %v187_v52 = vsel %vm186_vm15, %v184_v50, 0.0  ;;  %v203_v57 = vpop.xlane.xlu0 %202  ;;  %v477_v10 = vpop.eup %476 }
 0x21e   :  { %v204_v58 = vrot.slane %v203_v57, 4  ;;  %v318_v13 = vmul.f32 128.0, %v477_v10  ;;  %vm322_vm3 = vweird.f32 %v477_v10 }
 0x21f   :  { %v159_v47 = vadd.f32 %v157_v46, %v143_v25 }
 0x220   :  { %v205_v59 = vadd.f32 %v204_v58, %v203_v57  ;;  %v319_v15 = vsub.f32 1.0, %v318_v13 }
 0x221   :  { %v183_v49 = vsub.f32 %v159_v47, %v175_v48 }
 0x222   :  { %v206_v60 = vrot.slane %v205_v59, 2  ;;  %v320_v19 = vmul.f32 %v477_v10, %v319_v15 }
 0x223   :  { %v185_v51 = vmul.f32 %v413_v34, %v183_v49 }
 0x224   :  { %v207_v0 = vadd.f32 %v206_v60, %v205_v59  ;;  %v321_v25 = vadd.f32 %v477_v10, %v320_v19 }
 0x225   :  { %v188_v53 = vsel %vm186_vm15, %v185_v51, 0.0 }
 0x226   :  { %v189_v54 = vadd.f32 %v188_v53, %v187_v52  ;;  %v208_v4 = vrot.slane %v207_v0, 1  ;;  %v323_v31 = vsel %vm322_vm3, %v477_v10, %v321_v25 }
 0x228   :  { %190 = vadd.xlane.f32.xlu1 %v189_v54  ;;  %v209_v3 = vadd.f32 %v208_v4, %v207_v0 }
 0x230   :  { %308 = vadd.xlane.f32.xlu1 %v307_v56 }
 0x29b   :  { %v191_v61 = vpop.xlane.xlu1 %190 }
 0x29c   :  { %v192_v62 = vrot.slane %v191_v61, 4 }
 0x29e   :  { %v193_v63 = vadd.f32 %v192_v62, %v191_v61 }
 0x2a0   :  { %v194_v1 = vrot.slane %v193_v63, 2 }
 0x2a2   :  { %v195_v2 = vadd.f32 %v194_v1, %v193_v63 }
 0x2a3   :  { %v309_v8 = vpop.xlane.xlu1 %308 }
 0x2a4   :  { %v196_v5 = vrot.slane %v195_v2, 1  ;;  %v310_v9 = vrot.slane %v309_v8, 4 }
 0x2a6   :  { %v197_v6 = vadd.f32 %v196_v5, %v195_v2  ;;  %v311_v12 = vadd.f32 %v310_v9, %v309_v8 }
 0x2a8   :  { %434 = vpush %v197_v6  ;;  %v312_v14 = vrot.slane %v311_v12, 2 }
 0x2a9   :  { %436 = vpush %v209_v3 }
 0x2aa   :  { %v313_v18 = vadd.f32 %v312_v14, %v311_v12 }
 0x2ac   :  { %v314_v24 = vrot.slane %v313_v18, 1 }
 0x2ae   :  { %v315_v30 = vadd.f32 %v314_v24, %v313_v18 }
 0x2d9   :  { %s726_s8 = spop %434 }
 0x2da   :  { %s437_s25 = spop %436 }
 0x2db   :  { %s211_s4 = smax.f32 %s591_s5, %s437_s25 }
 0x2dc   :  { %v212_v11 = vstv %s211_s4 }
 0x2dd   :  { %478 = vrcp.f32 %v212_v11  ;;  %v224_v21 = vand.u32 2147483648, %v212_v11  ;;  %v222_v23 = vand.u32 2147483647, %v212_v11  ;;  %vm218_vm2 = vweird.f32 %v212_v11 }
 0x2df   :  { %v225_v27 = vor.u32 1.1754944e-38, %v224_v21  ;;  %vm223_vm5 = vcmp.eq.f32.partialorder %v222_v23, 8.507059e+37 }
 0x2e3   :  { %v479_v16 = vpop.eup %478 }
 0x2e4   :  { %v214_v17 = vmul.f32 %v479_v16, %v212_v11  ;;  %vm219_vm1 = vweird.f32 %v479_v16 }
 0x2e5   :  { %vm220_vm4 = vmor %vm218_vm2, %vm219_vm1 }
 0x2e6   :  { %v215_v20 = vsub.f32 1.0, %v214_v17 }
 0x2e8   :  { %v216_v22 = vmul.f32 %v479_v16, %v215_v20 }
 0x2ea   :  { %v217_v26 = vadd.f32 %v479_v16, %v216_v22 }
 0x2ec   :  { %v221_v28 = vsel %vm220_vm4, %v479_v16, %v217_v26 }
 0x2ed   :  { %v226_v29 = vsel %vm223_vm5, %v225_v27, %v221_v28 }
 0x2ee   :  { %438 = vpush %v226_v29 }
 0x2ef   :  { %440 = vpush %v315_v30 }
 0x2f0   :  { %442 = vpush %v323_v31 }
 0x31f   :  { %s439_s12 = spop %438 }
 0x320   :  { %s228_s1 = smul.f32 %s439_s12, %s726_s8  ;;  %s441_s3 = spop %440 }
 0x321   :  { %s443_s6 = spop %442 }
 0x322   :  { %v229_v32 = vstv %s228_s1  ;;  %s325_s15 = smul.f32 %s443_s6, %s441_s3 }
 0x323   :  { %231 = vst.msk [vmem:[#allocation6] sm:$0x1] %vm230_vm6, %v229_v32 }
 0x324   :  { %v326_v33 = vstv %s325_s15  ;;  %364 = dma.vmem_to_hbm [thread:$0]  %s360_s26, 16, %s362_s29, [#allocation5]  }
 0x325   :  { %327 = vst.msk [vmem:[#allocation7] sm:$0x1] %vm230_vm6, %v326_v33 }
 0x326   :  { %375 = dma.vmem_to_hbm [thread:$0]  %s371_s14, 16, %s373_s2, [#allocation8]  }
 0x327   :  { %576 = dma.done.wait [#allocation3], 256  }
 0x328   :  { %577 = vsyncadd [#allocation3], 4294967040 }
 0x329   :  { %578 = dma.done.wait [#allocation5], 272  }
 0x32a   :  { %579 = vsyncadd [#allocation5], 4294967024 }
 0x32b   :  { %580 = dma.done.wait [#allocation8], 16  }
 0x32c   :  { %581 = vsyncadd [#allocation8], 4294967280 }
 0x32d   :  { %392 = vsyncpa [#allocation3], 1 }
 0x32e   :  { %393 = vsyncpa [#allocation5], 1 }
 0x32f   :  { %394 = vsyncpa [#allocation8], 1 }

// kernel: full_model_forward.2
= control target key start
LH: loop header
LB: loop body
LE: loop exit
PB: predicated region body
PF: predicated region fallthrough
CT: control target
= control target key end

     0   :  { %s1499_s30 = smov 0   ;;  %s1501_s10 = smov 0   ;;  %s1697_s0 = inlined_call_operand.vmem [shape: f32[2,8,64], index: 0, kind: input, shape index: {}]   ;;  %s1698_s1 = inlined_call_operand.vmem [shape: f32[2,1,8], index: 1, kind: input, shape index: {}]   ;;  %s1699_s2 = inlined_call_operand.vmem [shape: f32[8,256], index: 2, kind: input, shape index: {}]   ;;  %s1700_s3 = inlined_call_operand.vmem [shape: f32[2,1,64], index: 3, kind: input, shape index: {}]   ;;  %s1701_s4 = inlined_call_operand.vmem [shape: bf16[2,64,128], index: 4, kind: input, shape index: {}]   ;;  %s1702_s5 = inlined_call_operand.vmem [shape: bf16[2,64,64], index: 5, kind: input, shape index: {}]   ;;  %s1703_s6 = inlined_call_operand.vmem [shape: f32[2,1,64], index: 6, kind: input, shape index: {}]   ;;  %s1704_s7 = inlined_call_operand.vmem [shape: bf16[2,64,256], index: 7, kind: input, shape index: {}]   ;;  %s1705_s8 = inlined_call_operand.vmem [shape: bf16[2,128,64], index: 8, kind: input, shape index: {}]   ;;  %s1706_s9 = inlined_call_operand.vmem [shape: f32[2,8,64], index: 9, kind: output, shape index: {}]  }
   0x1   :  { %s1503_s11 = smov 0   ;;  %s1505_s12 = smov 0  }
   0x2   :  { %s1507_s13 = smov 0  }
   0x3 LB: > { %1710 = sst [smem:[#allocation3_spill]] %s1429_s11  ;;  %s28_s14 = sadd.s32 1, %s1429_s11  ;;  %s1437_s13 = sphi %s1507_s13, %s19_s13   ;;  %s1433_s12 = sphi %s1505_s12, %s1722_s12   ;;  %s1429_s11 = sphi %s1503_s11, %s1721_s11   ;;  %s1425_s10 = sphi %s1501_s10, %s1720_s10   ;;  %s1421_s30 = sphi %s1499_s30, %s1719_s30  }
   0x4   : > { %1711 = sst [smem:[#allocation4_spill]] %s1433_s12  ;;  %s31_s15 = sadd.s32 1, %s1433_s12 }
   0x5   : > { %1712 = sst [smem:[#allocation5_spill]] %s1437_s13  ;;  %p29_p0 = scmp.ge.s32.totalorder %s28_s14, 2 }
   0x6   : > { %p1173_p1 = scmp.ge.s32.totalorder %s1437_s13, 1  ;;  %p362_p2 = scmp.lt.s32.totalorder %s1437_s13, 5 }
   0x7   : > { %s1724_s14 = smov (%p29_p0, %s28_s14), 0  ;;  %s1726_s15 = smov (!%p29_p0, %s31_s15), %s1433_s12 }
   0x8   : > { %1713 = sst [smem:[#allocation6_spill]] %s1724_s14  ;;  %p363_p3 = pnand %p1173_p1, %p362_p2 }
   0x9   : > { %p33_p4 = scmp.ge.s32.totalorder %s1726_s15, 2  ;;  %p425_p5 = scmp.lt.s32.totalorder (!%p363_p3), %s1425_s10, 1 }
   0xa   : > { %366 = sbr.rel (%p363_p3) target bundleno = 2212 (0x8a4), region = 56  ;;  %p432_p6 = scmp.lt.s32.totalorder (!%p363_p3), %s1421_s30, 1 }
   0xb   : > { %s1728_s15 = smov (%p33_p4, %s1726_s15), 0  ;;  %p1184_p7 = scmp.ne.s32.totalorder (!%p363_p3), %s1421_s30, 0 }
   0xc   : > { %1714 = sst [smem:[#allocation7_spill]] %s1728_s15 }
   0xf   : > { %s1730_s10 = smov (!%p425_p5, %s1425_s10), 1 }
  0x10   : > { %s1535_s16 = scalar_select %p432_p6, %s1421_s30, 1 }
  0x11   : > { %s1174_s17 = sshll.u32 %s1730_s10, 3  ;;  %466 = sbr.rel (%p1184_p7) target bundleno = 24 (0x18), region = 60 }
  0x12   : > { %s428_s23 = scalar_lea.vmem %s1697_s0, %s1174_s17  ;;  %s1292_s27 = sshll.u32 %s1535_s16, 5 }
  0x13   : > { %s439_s11 = scalar_lea.vmem %s1701_s4, %s1292_s27  ;;  %s1560_s19 = scalar_lea.vmem %s1702_s5, %s1292_s27 }
  0x14   : > { %s1294_s21 = sshll.u32 %s1535_s16, 6  ;;  %s1566_s24 = scalar_lea.vmem %s1706_s9, %s1174_s17 }
  0x15   : > { %s1571_s28 = scalar_lea.vmem %s1704_s7, %s1294_s21  ;;  %s1576_s12 = scalar_lea.vmem %s1705_s8, %s1294_s21 }
  0x16   : > { %v467_v0 = vld [vmem:[%s428_s23] sm:$0xff]  ;;  %vm468_vm0 = vcmask 523264  }
  0x17   : > { %469 = vst.msk [vmem:[%s1566_s24] sm:$0xff] %vm468_vm0, %v467_v0 }
  0x18 PF: > { %vm504_vm1 = vcmask 523264   ;;  %v1439_v4 = vmov 64.0   ;;  %v1299_v6 = vld [vmem:[%s439_s11 + $0x18] sm:$0xff]  ;;  %v1298_v8 = vld [vmem:[%s439_s11 + $0x10] sm:$0xff]  ;;  %v1297_v10 = vld [vmem:[%s439_s11 + $0x8] sm:$0xff]  ;;  %s1715_s13 = scalar_lea.vmem %s1700_s3, %s1535_s16  ;;  %s1440_s14 = smov 8   ;;  %v473_v31 = vlaneseq }
  0x19   : > { %1373 = vrcp.f32 %v1439_v4  ;;  %572 = vmatpush.bf16.msra.mxu0 %v1299_v6  ;;  %v1296_v12 = vld [vmem:[%s439_s11] sm:$0xff]  ;;  %s1441_s15 = smov 120   ;;  %v472_v37 = vld [vmem:[%s1699_s2 + $0x8] sm:$0xff]  ;;  %s1442_s27 = smov 112   ;;  %vm610_vm7 = vcmask 130048   ;;  %vm635_vm10 = vcmask 64512  }
  0x1a   : > { %v1370_v24 = vld [vmem:[%s1715_s13] ss:$0 sm:$0xff]  ;;  %v477_v32 = vand.u32 127, %v473_v31  ;;  %s1443_s18 = smov 64   ;;  %v474_v50 = vshrl.u32 %v473_v31, 7  ;;  %s1716_s25 = scalar_lea.vmem %s1698_s1, %s1730_s10  ;;  %vm667_vm11 = vcmask 1043456  }
  0x1b   : > { %v471_v35 = vld [vmem:[%s1699_s2] sm:$0xff]  ;;  %v1444_v54 = vmov -1e+09   ;;  %s1445_s10 = smov 48   ;;  %s1446_s29 = smov 96   ;;  %vm690_vm12 = vcmask 261248  }
  0x1c   : > { %v585_v33 = vand.u32 15, %v477_v32  ;;  %v482_v51 = vand.u32 7, %v474_v50  ;;  %v475_v52 = vadd.s32 8, %v474_v50  ;;  %v1371_v53 = vld [vmem:[%s1716_s25] ss:$0 sm:$0xff]  ;;  %s1447_s30 = smov 32   ;;  %s1717_s13 = scalar_lea.vmem %s1703_s6, %s1535_s16 }
  0x1d   : > { %573 = vmatpush.bf16.msra.mxu0 %v1298_v8  ;;  %s1448_s11 = smov 16   ;;  %vm770_vm13 = vcmask 392448   ;;  %vm776_vm14 = vcmask 523648  }
  0x1e   : > { %v1581_v1 = vld [vmem:[%s1566_s24] sm:$0xff]  ;;  %vm588_vm6 = vcmp.ge.s32.totalorder %v585_v33, 8  ;;  %vm492_vm8 = vcmp.le.s32.totalorder %v477_v32, %v482_v51  ;;  %v489_v56 = vand.u32 7, %v475_v52 }
  0x1f   : > { %v503_v2 = vmul.f32 %v1581_v1, %v1581_v1  ;;  %v1374_v5 = vpop.eup %1373  ;;  %v494_v55 = vsel %vm492_vm8, 0.0, %v1444_v54 }
  0x20   : > { %v509_v7 = vmul.f32 64.0, %v1374_v5  ;;  %vm513_vm2 = vweird.f32 %v1374_v5  ;;  %v500_v57 = vadd.f32 %v1371_v53, %v494_v55  ;;  %vm493_vm9 = vcmp.le.s32.totalorder %v477_v32, %v489_v56 }
  0x21   : > { %v505_v3 = vsel %vm504_vm1, %v503_v2, 0.0  ;;  %574 = vmatpush.bf16.msra.mxu0 %v1297_v10  ;;  %v495_v61 = vsel %vm493_vm9, 0.0, %v1444_v54 }
  0x22   : > { %506 = vadd.xlane.f32.xlu0 %v505_v3  ;;  %v510_v9 = vsub.f32 1.0, %v509_v7  ;;  %v501_v63 = vadd.f32 %v1371_v53, %v495_v61 }
  0x24   : > { %v511_v11 = vmul.f32 %v1374_v5, %v510_v9 }
  0x25   : > { %575 = vmatpush.bf16.msra.mxu0 %v1296_v12 }
  0x26   : > { %v512_v13 = vadd.f32 %v1374_v5, %v511_v11 }
  0x28   : > { %v1586_v14 = vsel %vm513_vm2, %v1374_v5, %v512_v13 }
  0x95   : > { %v507_v15 = vpop.xlane.xlu0 %506 }
  0x96   : > { %v515_v16 = vmul.f32 %v1586_v14, %v507_v15 }
  0x98   : > { %v516_v17 = vadd.f32 1e-05, %v515_v16 }
  0x9a   : > { %1375 = vrsqrt.f32 %v516_v17  ;;  %vm523_vm4 = vweird.f32 %v516_v17 }
  0xa0   : > { %v1376_v18 = vpop.eup %1375 }
  0xa1   : > { %v518_v19 = vmul.f32 %v1376_v18, %v516_v17  ;;  %vm524_vm3 = vweird.f32 %v1376_v18 }
  0xa2   : > { %vm525_vm5 = vmor %vm523_vm4, %vm524_vm3 }
  0xa3   : > { %v519_v20 = vmul.f32 %v1376_v18, %v518_v19 }
  0xa5   : > { %v520_v21 = vmul.f32 0.5, %v519_v20 }
  0xa7   : > { %v521_v22 = vsub.f32 1.5, %v520_v21 }
  0xa9   : > { %v522_v23 = vmul.f32 %v1376_v18, %v521_v22 }
  0xab   : > { %v526_v25 = vsel %vm525_vm5, %v1376_v18, %v522_v23 }
  0xac   : > { %v527_v26 = vmul.f32 %v526_v25, %v1581_v1 }
  0xae   : > { %v531_v27 = vmul.f32 %v1370_v24, %v527_v26 }
  0xb0   : > { %v532_v28 = vpack.c.bf16 %v531_v27, %v531_v27 }
  0xb2   : > { %1201 = vmatmul.msk.bf16.vlgmr.msra.gmra.mxu0 %vm504_vm1, %v532_v28 }
 0x12f   : > { %v1596_v29 = vpop.f32.mrf.mxu0 }
 0x130   : > { %589 = vrot.lane.b32.xlu1 %v1596_v29, %s1440_s14  ;;  %591 = vrot.lane.b32.xlu0 %v1596_v29, %s1441_s15  ;;  %v595_v40 = vmul.f32 %v1596_v29, %v471_v35  ;;  %v599_v16 = vpack.c.bf16 %v1596_v29, %v1596_v29 }
 0x132   : > { %v660_v17 = vunpack.c.l.b16 %v599_v16  ;;  %v1310_v16 = vld [vmem:[%s1571_s28 + $0x34] sm:$0xf] }
 0x134   : > { %v661_v18 = vpack.c.b16 %v660_v17, %v660_v17 }
 0x137   : > { %v579_v30 = vpop.f32.mrf.mxu0 }
 0x1a2   : > { %v592_v34 = vpop.permute.xlu0 %591  ;;  %v590_v38 = vpop.permute.xlu1 %589 }
 0x1a3   : > { %v593_v36 = vsub.f32 0.0, %v592_v34 }
 0x1a5   : > { %v594_v39 = vsel %vm588_vm6, %v590_v38, %v593_v36 }
 0x1a6   : > { %v596_v41 = vmul.f32 %v594_v39, %v472_v37 }
 0x1a8   : > { %v597_v42 = vadd.f32 %v596_v41, %v595_v40 }
 0x1aa   : > { %601 = vrot.lane.b32.xlu2 %v597_v42, %s1442_s27  ;;  %v598_v43 = vpack.c.bf16 %v597_v42, %v597_v42 }
 0x1ac   : > { %v606_v44 = vunpack.c.l.b16 %v598_v43 }
 0x1ae   : > { %v607_v45 = vpack.c.b16 %v606_v44, %v606_v44 }
 0x1b0   : > { %608 = vrot.lane.b32.xlu1 %v607_v45, %s1443_s18 }
 0x204   : > { %v602_v48 = vpop.permute.xlu2 %601 }
 0x205   : > { %v604_v49 = vpack.c.bf16 %v602_v48, %v597_v42 }
 0x222   : > { %v609_v46 = vpop.permute.xlu1 %608 }
 0x223   : > { %v615_v47 = vsel %vm610_vm7, %v609_v46, 0 }
 0x224   : > { %624 = vmatpush.bf16.xpose.msra.mxu1 %v615_v47 }
 0x22b   : > { %1202 = vmatmul.msk.bf16.vlgmr.msra.gmra.mxu1 %vm610_vm7, %v604_v49 }
 0x2a8   : > { %v626_v58 = vpop.f32.mrf.mxu1 }
 0x2a9   : > { %v631_v59 = vmul.f32 0.25, %v626_v58 }
 0x2ab   : > { %v633_v60 = vadd.f32 %v631_v59, %v500_v57 }
 0x2ad   : > { %v636_v62 = vsel %vm635_vm10, %v633_v60, -inf }
 0x2ae   : > { %637 = vmax.xlane.f32.xlu2 %v636_v62 }
 0x2b0   : > { %v628_v0 = vpop.f32.mrf.mxu1 }
 0x2b1   : > { %v632_v2 = vmul.f32 0.25, %v628_v0  ;;  %v1302_v0 = vld [vmem:[%s1560_s19 + $0x10] sm:$0xff] }
 0x2b3   : > { %v634_v3 = vadd.f32 %v632_v2, %v501_v63  ;;  %v1301_v2 = vld [vmem:[%s1560_s19 + $0x8] sm:$0xff] }
 0x2b5   : > { %v639_v4 = vsel %vm635_vm10, %v634_v3, -inf }
 0x2b6   : > { %640 = vmax.xlane.f32.xlu1 %v639_v4 }
 0x2cf   : > { %695 = vrot.lane.b32.xlu1 %v607_v45, %s1445_s10 }
 0x321   : > { %v638_v5 = vpop.xlane.xlu2 %637 }
 0x322   : > { %v642_v6 = vsub.f32 %v633_v60, %v638_v5 }
 0x324   : > { %v644_v7 = vmul.f32 1.442695, %v642_v6 }
 0x326   : > { %1377 = vpow2.f32 %v644_v7 }
 0x329   : > { %v641_v8 = vpop.xlane.xlu1 %640 }
 0x32a   : > { %v643_v9 = vsub.f32 %v634_v3, %v641_v8  ;;  %v1300_v3 = vld [vmem:[%s1560_s19] sm:$0xff] }
 0x32c   : > { %v1378_v10 = vpop.eup %1377  ;;  %v646_v11 = vmul.f32 1.442695, %v643_v9 }
 0x32d   : > { %v648_v12 = vsel %vm635_vm10, %v1378_v10, 0.0 }
 0x32e   : > { %1379 = vpow2.f32 %v646_v11  ;;  %649 = vadd.xlane.f32.xlu0 %v648_v12 }
 0x334   : > { %v1380_v13 = vpop.eup %1379 }
 0x335   : > { %v651_v15 = vsel %vm635_vm10, %v1380_v13, 0.0 }
 0x336   : > { %652 = vadd.xlane.f32.xlu2 %v651_v15  ;;  %v1311_v15 = vld [vmem:[%s1571_s28 + $0x34] sm:$0xf0] }
 0x341   : > { %v696_v23 = vpop.permute.xlu1 %695 }
 0x342   : > { %693 = vrot.lane.b32.xlu0 %v604_v49, %s1446_s29  ;;  %v701_v28 = vsel %vm610_vm7, %v696_v23, 0  ;;  %v1243_v23 = vld [vmem:[%s1571_s28 + $0x28] sm:$0xf0] }
 0x34e   : > { %662 = vrot.lane.b32.xlu2 %v661_v18, %s1447_s30 }
 0x3a1   : > { %v650_v19 = vpop.xlane.xlu0 %649 }
 0x3a2   : > { %1381 = vrcp.f32 %v650_v19 }
 0x3a8   : > { %v1382_v21 = vpop.eup %1381 }
 0x3a9   : > { %v653_v20 = vpop.xlane.xlu2 %652  ;;  %v656_v25 = vmul.f32 %v1382_v21, %v1378_v10  ;;  %v1308_v21 = vld [vmem:[%s1571_s28 + $0x24] sm:$0xf] }
 0x3aa   : > { %1383 = vrcp.f32 %v653_v20  ;;  %v1309_v20 = vld [vmem:[%s1571_s28 + $0x24] sm:$0xf0] }
 0x3b0   : > { %v1384_v22 = vpop.eup %1383 }
 0x3b1   : > { %v663_v24 = vpop.permute.xlu2 %662  ;;  %v657_v26 = vmul.f32 %v1384_v22, %v1380_v13  ;;  %v1249_v13 = vld [vmem:[%s1571_s28 + $0x30] sm:$0xf] }
 0x3b2   : > { %v669_v27 = vsel %vm667_vm11, %v663_v24, 0  ;;  %v1250_v17 = vor.u32 %v1311_v15, %v1249_v13  ;;  %v1246_v24 = vor.u32 %v1308_v21, %v1243_v23 }
 0x3b3   : > { %678 = vmatpush.bf16.msra.mxu3 %v669_v27  ;;  %v658_v29 = vpack.c.bf16 %v657_v26, %v656_v25  ;;  %v1233_v25 = vld [vmem:[%s1571_s28 + $0x10] sm:$0xf]  ;;  %v1307_v26 = vld [vmem:[%s1571_s28 + $0x14] sm:$0xf0]  ;;  %v1306_v27 = vld [vmem:[%s1571_s28 + $0x14] sm:$0xf] }
 0x3b4   : > { %v694_v30 = vpop.permute.xlu0 %693 }
 0x3b6   : > { %1203 = vmatmul.msk.bf16.vlgmr.msra.gmra.mxu3 %vm635_vm10, %v658_v29  ;;  %v1235_v29 = vld [vmem:[%s1571_s28 + $0x18] sm:$0xf0] }
 0x3b7   : > { %710 = vmatpush.bf16.xpose.msrb.mxu3 %v701_v28  ;;  %v1234_v28 = vor.u32 %v1307_v26, %v1233_v25 }
 0x3bf   : > { %907 = vmatpush.bf16.msra.mxu3 %v1250_v17 }
 0x3c6   : > { %1204 = vmatmul.msk.bf16.vlgmr.msrb.gmra.mxu3 %vm610_vm7, %v694_v30  ;;  %v1238_v30 = vor.u32 %v1306_v27, %v1235_v29 }
 0x439   : > { %v680_v31 = vpop.f32.mrf.mxu3 }
 0x43a   : > { %685 = vst.msk [vmem:[#allocation2] sm:$0xff] %vm610_vm7, %v680_v31  ;;  %v1225_v31 = vld [vmem:[%s1571_s28] sm:$0xf] }
 0x441   : > { %v682_v32 = vpop.f32.mrf.mxu3 }
 0x449   : > { %v712_v33 = vpop.f32.mrf.mxu3 }
 0x44a   : > { %v717_v34 = vmul.f32 0.25, %v712_v33  ;;  %v1304_v33 = vld [vmem:[%s1571_s28 + $0x4] sm:$0xf] }
 0x44c   : > { %v719_v35 = vadd.f32 %v717_v34, %v500_v57 }
 0x44e   : > { %v721_v36 = vsel %vm635_vm10, %v719_v35, -inf }
 0x44f   : > { %722 = vmax.xlane.f32.xlu2 %v721_v36 }
 0x451   : > { %v714_v37 = vpop.f32.mrf.mxu3 }
 0x452   : > { %v718_v38 = vmul.f32 0.25, %v714_v37 }
 0x454   : > { %v720_v39 = vadd.f32 %v718_v38, %v501_v63  ;;  %v1303_v63 = vld [vmem:[%s1560_s19 + $0x18] sm:$0xff] }
 0x455   : > { %819 = vmatpush.bf16.msrb.mxu1 %v1303_v63 }
 0x456   : > { %v724_v40 = vsel %vm635_vm10, %v720_v39, -inf }
 0x457   : > { %725 = vmax.xlane.f32.xlu1 %v724_v40 }
 0x459   : > { %820 = vmatpush.bf16.msrb.mxu1 %v1302_v0 }
 0x45d   : > { %821 = vmatpush.bf16.msrb.mxu1 %v1301_v2 }
 0x461   : > { %822 = vmatpush.bf16.msrb.mxu1 %v1300_v3 }
 0x470   : > { %744 = vrot.lane.b32.xlu1 %v661_v18, %s1448_s11  ;;  %v1251_v18 = vld [vmem:[%s1571_s28 + $0x38] sm:$0xf0] }
 0x471   : > { %v1254_v19 = vor.u32 %v1310_v16, %v1251_v18 }
 0x473   : > { %920 = vmatpush.bf16.msrb.mxu0 %v1254_v19 }
 0x477   : > { %921 = vmatpush.bf16.msrb.mxu0 %v1246_v24 }
 0x47b   : > { %922 = vmatpush.bf16.msrb.mxu0 %v1238_v30 }
 0x4c2   : > { %v723_v41 = vpop.xlane.xlu2 %722 }
 0x4c3   : > { %v727_v42 = vsub.f32 %v719_v35, %v723_v41  ;;  %v1227_v35 = vld [vmem:[%s1571_s28 + $0x8] sm:$0xf0] }
 0x4c4   : > { %v1230_v36 = vor.u32 %v1304_v33, %v1227_v35 }
 0x4c5   : > { %v729_v43 = vmul.f32 1.442695, %v727_v42 }
 0x4c6   : > { %923 = vmatpush.bf16.msrb.mxu0 %v1230_v36 }
 0x4c7   : > { %1385 = vpow2.f32 %v729_v43 }
 0x4ca   : > { %v726_v44 = vpop.xlane.xlu1 %725 }
 0x4cb   : > { %v728_v45 = vsub.f32 %v720_v39, %v726_v44 }
 0x4cd   : > { %v1386_v46 = vpop.eup %1385  ;;  %v731_v47 = vmul.f32 1.442695, %v728_v45 }
 0x4ce   : > { %v733_v48 = vsel %vm635_vm10, %v1386_v46, 0.0 }
 0x4cf   : > { %1387 = vpow2.f32 %v731_v47  ;;  %734 = vadd.xlane.f32.xlu0 %v733_v48 }
 0x4d5   : > { %v1388_v49 = vpop.eup %1387 }
 0x4d6   : > { %v736_v50 = vsel %vm635_vm10, %v1388_v49, 0.0 }
 0x4d7   : > { %737 = vadd.xlane.f32.xlu2 %v736_v50  ;;  %v1319_v50 = vld [vmem:[%s1576_s12 + $0x38] sm:$0xff] }
 0x4e2   : > { %v745_v51 = vpop.permute.xlu1 %744 }
 0x4e3   : > { %v750_v52 = vsel %vm667_vm11, %v745_v51, 0  ;;  %v1318_v51 = vld [vmem:[%s1576_s12 + $0x30] sm:$0xff] }
 0x4e4   : > { %759 = vmatpush.bf16.msra.mxu2 %v750_v52  ;;  %v1317_v52 = vld [vmem:[%s1576_s12 + $0x28] sm:$0xff] }
 0x4e8   : > { %1015 = vmatpush.bf16.msrb.mxu2 %v1319_v50 }
 0x4ec   : > { %1016 = vmatpush.bf16.msrb.mxu2 %v1318_v51 }
 0x4ef   : > { %687 = vrot.lane.b32.xlu2 %v682_v32, %s1448_s11  ;;  %v1305_v32 = vld [vmem:[%s1571_s28 + $0x4] sm:$0xf0] }
 0x4f0   : > { %v1226_v34 = vor.u32 %v1305_v32, %v1225_v31  ;;  %1017 = vmatpush.bf16.msrb.mxu2 %v1317_v52 }
 0x542   : > { %v735_v53 = vpop.xlane.xlu0 %734 }
 0x543   : > { %1389 = vrcp.f32 %v735_v53  ;;  %v1316_v53 = vld [vmem:[%s1576_s12 + $0x20] sm:$0xff] }
 0x544   : > { %1018 = vmatpush.bf16.msrb.mxu2 %v1316_v53 }
 0x549   : > { %v1390_v55 = vpop.eup %1389 }
 0x54a   : > { %v738_v54 = vpop.xlane.xlu2 %737  ;;  %v741_v58 = vmul.f32 %v1390_v55, %v1386_v46  ;;  %v1372_v46 = vld [vmem:[%s1717_s13] ss:$0 sm:$0xff]  ;;  %v1314_v55 = vld [vmem:[%s1576_s12 + $0x10] sm:$0xff] }
 0x54b   : > { %1391 = vrcp.f32 %v738_v54  ;;  %v1315_v54 = vld [vmem:[%s1576_s12 + $0x18] sm:$0xff] }
 0x54c   : > { %1019 = vmatpush.bf16.msrb.mxu2 %v1315_v54 }
 0x550   : > { %1020 = vmatpush.bf16.msrb.mxu2 %v1314_v55 }
 0x551   : > { %v1392_v56 = vpop.eup %1391 }
 0x552   : > { %v688_v57 = vpop.permute.xlu2 %687  ;;  %v742_v59 = vmul.f32 %v1392_v56, %v1388_v49 }
 0x553   : > { %691 = vst.msk [vmem:[#allocation2] sm:$0xff] %vm690_vm12, %v688_v57  ;;  %v1313_v57 = vld [vmem:[%s1576_s12 + $0x8] sm:$0xff] }
 0x554   : > { %v743_v60 = vpack.c.bf16 %v742_v59, %v741_v58  ;;  %1021 = vmatpush.bf16.msrb.mxu2 %v1313_v57  ;;  %v1312_v58 = vld [vmem:[%s1576_s12] sm:$0xff] }
 0x556   : > { %1205 = vmatmul.msk.bf16.vlgmr.msra.gmra.mxu2 %vm635_vm10, %v743_v60 }
 0x558   : > { %1022 = vmatpush.bf16.msrb.mxu2 %v1312_v58 }
 0x5d9   : > { %v761_v61 = vpop.f32.mrf.mxu2 }
 0x5da   : > { %767 = vrot.lane.b32.xlu0 %v761_v61, %s1447_s30 }
 0x5e1   : > { %v763_v62 = vpop.f32.mrf.mxu2 }
 0x5e2   : > { %773 = vrot.lane.b32.xlu1 %v763_v62, %s1445_s10 }
 0x64c   : > { %v768_v4 = vpop.permute.xlu0 %767 }
 0x64d   : > { %771 = vst.msk [vmem:[#allocation2] sm:$0xff] %vm770_vm13, %v768_v4 }
 0x654   : > { %v774_v5 = vpop.permute.xlu1 %773 }
 0x655   : > { %777 = vst.msk [vmem:[#allocation2] sm:$0xff] %vm776_vm14, %v774_v5 }
 0x65c   : > { %v778_v6 = vld [vmem:[#allocation2] sm:$0xff] }
 0x65d   : > { %v779_v7 = vpack.c.bf16 %v778_v6, %v778_v6 }
 0x65f   : > { %1222 = vmatmul.msk.bf16.vlgmr.msrb.gmra.mxu1 %vm504_vm1, %v779_v7 }
 0x6dc   : > { %v824_v8 = vpop.f32.mrf.mxu1 }
 0x6dd   : > { %v1641_v9 = vadd.f32 %v824_v8, %v1581_v1  ;;  %v1241_v1 = vld [vmem:[%s1571_s28 + $0x20] sm:$0xf] }
 0x6de   : > { %v1242_v22 = vor.u32 %v1309_v20, %v1241_v1 }
 0x6df   : > { %v830_v10 = vmul.f32 %v1641_v9, %v1641_v9 }
 0x6e0   : > { %908 = vmatpush.bf16.msra.mxu3 %v1242_v22 }
 0x6e1   : > { %v831_v11 = vsel %vm504_vm1, %v830_v10, 0.0 }
 0x6e2   : > { %832 = vadd.xlane.f32.xlu0 %v831_v11 }
 0x6e4   : > { %v826_v12 = vpop.f32.mrf.mxu1  ;;  %909 = vmatpush.bf16.msra.mxu3 %v1234_v28 }
 0x6e8   : > { %910 = vmatpush.bf16.msra.mxu3 %v1226_v34 }
 0x755   : > { %v833_v37 = vpop.xlane.xlu0 %832 }
 0x756   : > { %v834_v38 = vmul.f32 %v833_v37, %v1586_v14 }
 0x758   : > { %v835_v39 = vadd.f32 1e-05, %v834_v38 }
 0x75a   : > { %1393 = vrsqrt.f32 %v835_v39  ;;  %vm842_vm0 = vweird.f32 %v835_v39 }
 0x760   : > { %v1394_v40 = vpop.eup %1393 }
 0x761   : > { %v837_v41 = vmul.f32 %v1394_v40, %v835_v39  ;;  %vm843_vm15 = vweird.f32 %v1394_v40 }
 0x762   : > { %vm844_vm2 = vmor %vm842_vm0, %vm843_vm15 }
 0x763   : > { %v838_v42 = vmul.f32 %v1394_v40, %v837_v41 }
 0x765   : > { %v839_v43 = vmul.f32 0.5, %v838_v42 }
 0x767   : > { %v840_v44 = vsub.f32 1.5, %v839_v43 }
 0x769   : > { %v841_v45 = vmul.f32 %v1394_v40, %v840_v44 }
 0x76b   : > { %v845_v14 = vsel %vm844_vm2, %v1394_v40, %v841_v45 }
 0x76c   : > { %v846_v47 = vmul.f32 %v845_v14, %v1641_v9 }
 0x76e   : > { %v850_v48 = vmul.f32 %v1372_v46, %v846_v47 }
 0x770   : > { %v851_v49 = vpack.c.bf16 %v850_v48, %v850_v48 }
 0x772   : > { %1255 = vmatmul.msk.bf16.vlgmr.msra.gmra.mxu3 %vm504_vm1, %v851_v49  ;;  %1256 = vmatmul.msk.bf16.vlgmr.msrb.gmra.mxu0 %vm504_vm1, %v851_v49 }
 0x7ef   : > { %v925_v56 = vpop.f32.mrf.mxu0 }
 0x7f5   : > { %v912_v59 = vpop.f32.mrf.mxu3 }
 0x7f6   : > { %v1257_v60 = vmul.f32 -1.442695, %v912_v59 }
 0x7f7   : > { %v927_v61 = vpop.f32.mrf.mxu0 }
 0x7f8   : > { %1395 = vpow2.f32 %v1257_v60 }
 0x7fd   : > { %v914_v62 = vpop.f32.mrf.mxu3 }
 0x7fe   : > { %v1396_v63 = vpop.eup %1395 }
 0x7ff   : > { %v932_v0 = vadd.f32 1.0, %v1396_v63 }
 0x801   : > { %1397 = vrcp.f32 %v932_v0  ;;  %v944_v5 = vand.u32 2147483648, %v932_v0  ;;  %v942_v7 = vand.u32 2147483647, %v932_v0  ;;  %vm938_vm4 = vweird.f32 %v932_v0 }
 0x803   : > { %v945_v10 = vor.u32 1.1754944e-38, %v944_v5  ;;  %vm943_vm6 = vcmp.eq.f32.partialorder %v942_v7, 8.507059e+37 }
 0x807   : > { %v1398_v2 = vpop.eup %1397 }
 0x808   : > { %v934_v3 = vmul.f32 %v1398_v2, %v932_v0  ;;  %vm939_vm3 = vweird.f32 %v1398_v2 }
 0x809   : > { %vm940_vm5 = vmor %vm938_vm4, %vm939_vm3 }
 0x80a   : > { %v935_v4 = vsub.f32 1.0, %v934_v3 }
 0x80c   : > { %v936_v6 = vmul.f32 %v1398_v2, %v935_v4 }
 0x80e   : > { %v937_v8 = vadd.f32 %v1398_v2, %v936_v6 }
 0x810   : > { %v941_v11 = vsel %vm940_vm5, %v1398_v2, %v937_v8 }
 0x811   : > { %v946_v12 = vsel %vm943_vm6, %v945_v10, %v941_v11 }
 0x812   : > { %v948_v13 = vmul.f32 %v946_v12, %v912_v59 }
 0x814   : > { %v949_v15 = vmul.f32 %v948_v13, %v925_v56 }
 0x816   : > { %v950_v16 = vpack.c.bf16 %v949_v15, %v949_v15 }
 0x818   : > { %1023 = vmatmul.bf16.vlgmr.msrb.gmra.mxu2 %v950_v16 }
 0x89b   : > { %v1024_v17 = vpop.f32.mrf.mxu2 }
 0x89c   : > { %v1028_v18 = vadd.f32 %v1024_v17, %v1641_v9 }
 0x89e   : > { %1029 = vst.msk [vmem:[%s1566_s24] sm:$0xff] %vm504_vm1, %v1028_v18 }
 0x8a3   : > { %v1026_v19 = vpop.f32.mrf.mxu2 }
 0x8a4 PF: > { %s1718_s16 = sld [smem:[#allocation5_spill]] }
 0x8a5   : > { %s1719_s30 = sld [smem:[#allocation3_spill]] }
 0x8a6   : > { %s1720_s10 = sld [smem:[#allocation4_spill]] }
 0x8a7   : > { %s1721_s11 = sld [smem:[#allocation6_spill]] }
 0x8a8   : > { %s1722_s12 = sld [smem:[#allocation7_spill]] }
 0x8aa   : > { %s19_s13 = sadd.s32 1, %s1718_s16  }
 0x8ab   : > { %p16_p8 = scmp.ge.s32.totalorder %s19_s13, 6  }
 0x8ad   :  { %18 = sbr.rel (!%p16_p8) target bundleno = 3 (0x3), region = 111 }

</bundles_post_ra>
